<compile_context>
chip_gen: v6e
topology: v6e:2x2x1
jax: 0.10.0
libtpu: 0.0.40
codegen_flags: <defaults>
</compile_context>

<pallas_src>
import functools

import jax
import jax.numpy as jnp
import numpy as np
from jax.experimental import pallas as pl
from jax.experimental.pallas import tpu as pltpu

EPS = 1e-5  # nn.BatchNorm2d default eps

# ---- packed-parameter layout: every field starts on a 128-lane boundary ----
_W1 = 0      # conv1 weight (16, 27), column = (di*3 + dj)*3 + ic
_W2 = 128    # conv2 weight (64, 16)
_GA = 256    # folded head: fc2_w @ fc1_w[:, :64]   -> (A, 64), rows A:64 zero
_SC = 384    # scalar window (64, 8): col 0 bn1_g, 1 bn1_b, 2 bn2_g, 3 bn2_b,
             #   cols 4:6 fc2_w @ fc1_w[:, 64:66], col 6 fc2_w @ fc1_b + fc2_b
_NP = 512    # total packed columns (128 KiB f32, one DMA, resident over grid)


def dqn_kernel(x_ref, mask_ref, p_ref, out_ref, *, H, W, A):
    """One independent DQN state (batch=1 module forward) per grid step.

    x_ref    : (5, H*W)  rows 0:3 image channels, rows 3:5 aux feats (lane 0)
    mask_ref : (1, H*W)  1/P at valid conv-output positions, 0 elsewhere
    p_ref    : (64, _NP) packed parameters (constant index_map -> resident)
    out_ref  : (A, 1)    Q-values for this state
    """
    HW = H * W

    x = x_ref[...]
    img = x[0:3, :]                       # (3, HW) image channels
    y_col = x[3:5, 0:1]                   # (2, 1)  x[:, 3:, 0, 0]
    msk = mask_ref[...]                   # (1, HW), pre-scaled by 1/P

    # ---- conv1 (3x3 VALID) as 9 small MXU matmuls on lane-rolled views ------
    # Tap (di, dj) needs img[:, p + di*W + dj]; roll by HW - s provides exactly
    # that at every valid output position (wrap only lands on masked positions).
    # Conv biases are omitted: a per-channel constant is exactly cancelled by
    # the training-mode BatchNorm mean subtraction below.
    w1 = p_ref[0:16, _W1:_W1 + 27]        # (16, 27), one aligned load
    h1 = jnp.dot(w1[:, 0:3], img, preferred_element_type=jnp.float32)
    for k in range(1, 9):
        di, dj = divmod(k, 3)
        s = di * W + dj
        shifted = pltpu.roll(img, HW - s, axis=1)       # shifted[:, p] = img[:, p+s]
        h1 = h1 + jnp.dot(w1[:, 3 * k:3 * k + 3], shifted,
                          preferred_element_type=jnp.float32)

    # ---- per-channel scalars: one aligned (64, 8) window, sliced as values --
    scw = p_ref[:, _SC:_SC + 8]
    g1, be1 = scw[0:16, 0:1], scw[0:16, 1:2]
    g2, be2 = scw[:, 2:3], scw[:, 3:4]
    gb, gc = scw[:, 4:6], scw[:, 6:7]

    # ---- BatchNorm2d(16), training-mode stats over the P valid positions ----
    # One-pass sum / sum-of-squares, folded into a single per-channel affine.
    h1m = h1 * msk
    mu1 = jnp.sum(h1m, axis=1, keepdims=True)
    var1 = jnp.maximum(jnp.sum(h1m * h1, axis=1, keepdims=True) - mu1 * mu1, 0.0)
    a1 = jax.lax.rsqrt(var1 + EPS) * g1
    h1 = jnp.maximum(h1 * a1 + (be1 - mu1 * a1), 0.0)                 # ReLU

    # ---- conv2 (1x1) as channel matmul + BatchNorm2d(64) + ReLU -------------
    w2 = p_ref[:, _W2:_W2 + 16]
    h2 = jnp.dot(w2, h1, preferred_element_type=jnp.float32)
    h2m = h2 * msk
    mu2 = jnp.sum(h2m, axis=1, keepdims=True)
    var2 = jnp.maximum(jnp.sum(h2m * h2, axis=1, keepdims=True) - mu2 * mu2, 0.0)
    a2 = jax.lax.rsqrt(var2 + EPS) * g2
    h2 = jnp.maximum(h2 * a2 + (be2 - mu2 * a2), 0.0)

    # ---- AdaptiveAvgPool2d(1): masked spatial mean -> (64, 1) ---------------
    pooled = jnp.sum(h2 * msk, axis=1, keepdims=True)

    # ---- head: fc2(fc1(cat(pooled, y))), folded at pack time to one affine --
    ga = p_ref[:, _GA:_GA + 64]           # (64, 64), rows A:64 zero
    out_full = (jnp.dot(ga, pooled, preferred_element_type=jnp.float32)
                + jnp.dot(gb, y_col, preferred_element_type=jnp.float32)
                + gc)
    out_ref[...] = out_full[0:A, :]


def init_params(key, action_size):
    """Deterministic param init (PyTorch-default-style uniform fan-in bounds)."""
    ks = jax.random.split(key, 8)

    def unif(k, shape, fan_in):
        bound = 1.0 / jnp.sqrt(jnp.float32(fan_in))
        return jax.random.uniform(k, shape, jnp.float32, -bound, bound)

    p = {}
    p["conv1_w"] = unif(ks[0], (16, 3, 3, 3), 3 * 9)
    p["conv1_b"] = unif(ks[1], (16,), 3 * 9)
    p["bn1_g"] = jnp.ones((16,), jnp.float32)
    p["bn1_b"] = jnp.zeros((16,), jnp.float32)
    p["conv2_w"] = unif(ks[2], (64, 16, 1, 1), 16)
    p["conv2_b"] = unif(ks[3], (64,), 16)
    p["bn2_g"] = jnp.ones((64,), jnp.float32)
    p["bn2_b"] = jnp.zeros((64,), jnp.float32)
    p["fc1_w"] = unif(ks[4], (64, 66), 66)     # torch Linear weight is (out, in)
    p["fc1_b"] = unif(ks[5], (64,), 66)
    p["fc2_w"] = unif(ks[6], (action_size, 64), 64)
    p["fc2_b"] = unif(ks[7], (action_size,), 64)
    return p


def pack_params(p, action_size):
    """Pack parameters once at init into one (64, _NP) f32 buffer.

    Conv biases are intentionally NOT packed: training-mode BatchNorm subtracts
    the per-channel batch mean, which cancels any per-channel constant exactly.
    The fc1/fc2 pair (no activation in between) is folded here into GA/GB/gc.
    """
    A = action_size
    assert A <= 64, "packed layout assumes action_size <= 64"
    w1r = jnp.transpose(p["conv1_w"], (0, 2, 3, 1)).reshape(16, 27)
    ga = p["fc2_w"] @ p["fc1_w"][:, 0:64]                      # (A, 64)
    gb = p["fc2_w"] @ p["fc1_w"][:, 64:66]                     # (A, 2)
    gc = p["fc2_w"] @ p["fc1_b"] + p["fc2_b"]                  # (A,)

    buf = jnp.zeros((64, _NP), jnp.float32)
    buf = buf.at[0:16, _W1:_W1 + 27].set(w1r)
    buf = buf.at[:, _W2:_W2 + 16].set(p["conv2_w"].reshape(64, 16))
    buf = buf.at[0:A, _GA:_GA + 64].set(ga)
    buf = buf.at[0:16, _SC + 0].set(p["bn1_g"])
    buf = buf.at[0:16, _SC + 1].set(p["bn1_b"])
    buf = buf.at[:, _SC + 2].set(p["bn2_g"])
    buf = buf.at[:, _SC + 3].set(p["bn2_b"])
    buf = buf.at[0:A, _SC + 4:_SC + 6].set(gb)
    buf = buf.at[0:A, _SC + 6].set(gc)
    return buf


def dqn_forward(x, packed_params, action_size):
    """x: (N, 5, H, W). Each of the N states is an independent batch-1 forward
    of the PyTorch module (its fc1 requires exactly 64+2 features, i.e. batch=1
    per forward); all N are processed in one pallas_call with grid=(N,)."""
    N, C, H, W = x.shape
    assert C == 5, "module semantics require 3 image + 2 aux channels"
    assert H >= 3 and W >= 3
    HW = H * W
    Ho, Wo = H - 2, W - 2
    A = action_size

    # Free, contiguity-preserving reshape: image channels are rows 0:3, the two
    # aux features live at lane 0 of rows 3 and 4.
    X = x.reshape(N, 5, HW).astype(jnp.float32)

    # Static validity mask of conv-output positions, pre-scaled by 1/P.
    # Depends only on (H, W) => a compile-time constant under jit.
    m2 = np.zeros((H, W), np.float32)
    m2[:Ho, :Wo] = 1.0 / float(Ho * Wo)
    mask = jnp.asarray(m2.reshape(1, HW))

    out = pl.pallas_call(
        functools.partial(dqn_kernel, H=H, W=W, A=A),
        out_shape=jax.ShapeDtypeStruct((N, A, 1), jnp.float32),
        grid=(N,),
        in_specs=[
            pl.BlockSpec((None, 5, HW), lambda n: (n, 0, 0)),   # per-state input
            pl.BlockSpec((1, HW), lambda n: (0, 0)),            # mask, resident
            pl.BlockSpec((64, _NP), lambda n: (0, 0)),          # params, resident
        ],
        out_specs=pl.BlockSpec((None, A, 1), lambda n: (n, 0, 0)),
        compiler_params=pltpu.CompilerParams(
            dimension_semantics=("parallel",),        # states are independent
            vmem_limit_bytes=16 * 1024 * 1024),       # <<64 MiB (v7x-safe), ample headroom
    )(X, mask, packed_params)
    return out.reshape(N, A)


def dqn_reference(x, p):
    """Plain-JAX reference of the PyTorch module's forward (training-mode BN).
    x: (1, 5, H, W) -> (action_size,)."""
    y = x[:, 3:, 0, 0].reshape(-1)
    h = x[:, 0:3, :, :].astype(jnp.float32)
    dn = ("NCHW", "OIHW", "NCHW")
    h = jax.lax.conv_general_dilated(h, p["conv1_w"], (1, 1), "VALID",
                                     dimension_numbers=dn)
    h = h + p["conv1_b"][None, :, None, None]
    mu = h.mean(axis=(0, 2, 3), keepdims=True)
    var = ((h - mu) ** 2).mean(axis=(0, 2, 3), keepdims=True)
    h = (h - mu) / jnp.sqrt(var + EPS)
    h = h * p["bn1_g"][None, :, None, None] + p["bn1_b"][None, :, None, None]
    h = jnp.maximum(h, 0.0)
    h = jax.lax.conv_general_dilated(h, p["conv2_w"], (1, 1), "VALID",
                                     dimension_numbers=dn)
    h = h + p["conv2_b"][None, :, None, None]
    mu = h.mean(axis=(0, 2, 3), keepdims=True)
    var = ((h - mu) ** 2).mean(axis=(0, 2, 3), keepdims=True)
    h = (h - mu) / jnp.sqrt(var + EPS)
    h = h * p["bn2_g"][None, :, None, None] + p["bn2_b"][None, :, None, None]
    h = jnp.maximum(h, 0.0)
    pooled = h.mean(axis=(2, 3)).reshape(-1)
    z = jnp.concatenate([pooled, y], axis=0)
    f1 = p["fc1_w"] @ z + p["fc1_b"]
    return p["fc2_w"] @ f1 + p["fc2_b"]


if __name__ == "__main__":
    action_size = 4
    key = jax.random.PRNGKey(0)
    kx, kp = jax.random.split(key)

    # N independent single-state forwards batched into one kernel launch.
    N, H, W = 4, 16, 16
    x = jax.random.normal(kx, (N, 5, H, W), jnp.float32)
    params = init_params(kp, action_size)
    packed = pack_params(params, action_size)        # packed once at init

    fwd = jax.jit(functools.partial(dqn_forward, action_size=action_size))
    out = fwd(x, packed)
    jax.block_until_ready(out)
    assert out.shape == (N, action_size)

    ref = jnp.stack([dqn_reference(x[i:i + 1], params) for i in range(N)])
    if not np.allclose(np.asarray(out), np.asarray(ref), rtol=5e-3, atol=1e-3):
        raise AssertionError(
            "kernel/reference mismatch, max abs err "
            f"{float(jnp.max(jnp.abs(out - ref)))}")
    print("KERNEL_OK")
</pallas_src>

<mosaic_0001>
module attributes {stable_mosaic.version = 11 : i64} {
  func.func @dqn_kernel(%arg0: i32, %arg1: memref<1x5x256xf32, #tpu.memory_space<vmem>>, %arg2: memref<1x256xf32, #tpu.memory_space<vmem>>, %arg3: memref<64x512xf32, #tpu.memory_space<vmem>>, %arg4: memref<1x4x1xf32, #tpu.memory_space<vmem>>) attributes {dimension_semantics = [#tpu.dimension_semantics<parallel>], iteration_bounds = array<i64: 4>, scalar_prefetch = 0 : i64, scratch_operands = 0 : i64, tpu.core_type = #tpu.core_type<tc>, window_params = [{transform_indices = @transform_0, window_bounds = array<i64: 1, 5, 256>}, {pipeline_mode = #tpu.pipeline_mode<synchronous>, transform_indices = @transform_1, window_bounds = array<i64: 1, 256>}, {pipeline_mode = #tpu.pipeline_mode<synchronous>, transform_indices = @transform_2, window_bounds = array<i64: 64, 512>}, {transform_indices = @transform_3, window_bounds = array<i64: 1, 4, 1>}]} {
    %c0 = arith.constant 0 : index
    %c0_0 = arith.constant 0 : index
    %c0_1 = arith.constant 0 : index
    %0 = vector.load %arg1[%c0, %c0_0, %c0_1] : memref<1x5x256xf32, #tpu.memory_space<vmem>>, vector<1x5x256xf32>
    %1 = vector.shape_cast %0 : vector<1x5x256xf32> to vector<5x256xf32>
    %2 = vector.extract_strided_slice %1 {offsets = [0, 0], sizes = [3, 256], strides = [1, 1]} : vector<5x256xf32> to vector<3x256xf32>
    %3 = vector.extract_strided_slice %1 {offsets = [3, 0], sizes = [2, 1], strides = [1, 1]} : vector<5x256xf32> to vector<2x1xf32>
    %c0_2 = arith.constant 0 : index
    %c0_3 = arith.constant 0 : index
    %4 = vector.load %arg2[%c0_2, %c0_3] : memref<1x256xf32, #tpu.memory_space<vmem>>, vector<1x256xf32>
    %c0_4 = arith.constant 0 : index
    %c0_5 = arith.constant 0 : index
    %5 = vector.load %arg3[%c0_4, %c0_5] : memref<64x512xf32, #tpu.memory_space<vmem>>, vector<16x27xf32>
    %6 = vector.extract_strided_slice %5 {offsets = [0, 0], sizes = [16, 3], strides = [1, 1]} : vector<16x27xf32> to vector<16x3xf32>
    %cst = arith.constant dense<0.000000e+00> : vector<16x256xf32>
    %7 = tpu.matmul %6, %2, %cst {dimension_numbers = #tpu.dot_dimension_numbers<[1], [0], [0], [1], [0, 0, 1, 1], [], []>} : vector<16x3xf32>, vector<3x256xf32>, vector<16x256xf32> -> vector<16x256xf32>
    %c255_i32 = arith.constant 255 : i32
    %8 = tpu.dynamic_rotate %2 by %c255_i32 dim 1 : vector<3x256xf32>, i32 -> vector<3x256xf32>
    %9 = vector.extract_strided_slice %5 {offsets = [0, 3], sizes = [16, 3], strides = [1, 1]} : vector<16x27xf32> to vector<16x3xf32>
    %cst_6 = arith.constant dense<0.000000e+00> : vector<16x256xf32>
    %10 = tpu.matmul %9, %8, %cst_6 {dimension_numbers = #tpu.dot_dimension_numbers<[1], [0], [0], [1], [0, 0, 1, 1], [], []>} : vector<16x3xf32>, vector<3x256xf32>, vector<16x256xf32> -> vector<16x256xf32>
    %11 = arith.addf %7, %10 : vector<16x256xf32>
    %c254_i32 = arith.constant 254 : i32
    %12 = tpu.dynamic_rotate %2 by %c254_i32 dim 1 : vector<3x256xf32>, i32 -> vector<3x256xf32>
    %13 = vector.extract_strided_slice %5 {offsets = [0, 6], sizes = [16, 3], strides = [1, 1]} : vector<16x27xf32> to vector<16x3xf32>
    %cst_7 = arith.constant dense<0.000000e+00> : vector<16x256xf32>
    %14 = tpu.matmul %13, %12, %cst_7 {dimension_numbers = #tpu.dot_dimension_numbers<[1], [0], [0], [1], [0, 0, 1, 1], [], []>} : vector<16x3xf32>, vector<3x256xf32>, vector<16x256xf32> -> vector<16x256xf32>
    %15 = arith.addf %11, %14 : vector<16x256xf32>
    %c240_i32 = arith.constant 240 : i32
    %16 = tpu.dynamic_rotate %2 by %c240_i32 dim 1 : vector<3x256xf32>, i32 -> vector<3x256xf32>
    %17 = vector.extract_strided_slice %5 {offsets = [0, 9], sizes = [16, 3], strides = [1, 1]} : vector<16x27xf32> to vector<16x3xf32>
    %cst_8 = arith.constant dense<0.000000e+00> : vector<16x256xf32>
    %18 = tpu.matmul %17, %16, %cst_8 {dimension_numbers = #tpu.dot_dimension_numbers<[1], [0], [0], [1], [0, 0, 1, 1], [], []>} : vector<16x3xf32>, vector<3x256xf32>, vector<16x256xf32> -> vector<16x256xf32>
    %19 = arith.addf %15, %18 : vector<16x256xf32>
    %c239_i32 = arith.constant 239 : i32
    %20 = tpu.dynamic_rotate %2 by %c239_i32 dim 1 : vector<3x256xf32>, i32 -> vector<3x256xf32>
    %21 = vector.extract_strided_slice %5 {offsets = [0, 12], sizes = [16, 3], strides = [1, 1]} : vector<16x27xf32> to vector<16x3xf32>
    %cst_9 = arith.constant dense<0.000000e+00> : vector<16x256xf32>
    %22 = tpu.matmul %21, %20, %cst_9 {dimension_numbers = #tpu.dot_dimension_numbers<[1], [0], [0], [1], [0, 0, 1, 1], [], []>} : vector<16x3xf32>, vector<3x256xf32>, vector<16x256xf32> -> vector<16x256xf32>
    %23 = arith.addf %19, %22 : vector<16x256xf32>
    %c238_i32 = arith.constant 238 : i32
    %24 = tpu.dynamic_rotate %2 by %c238_i32 dim 1 : vector<3x256xf32>, i32 -> vector<3x256xf32>
    %25 = vector.extract_strided_slice %5 {offsets = [0, 15], sizes = [16, 3], strides = [1, 1]} : vector<16x27xf32> to vector<16x3xf32>
    %cst_10 = arith.constant dense<0.000000e+00> : vector<16x256xf32>
    %26 = tpu.matmul %25, %24, %cst_10 {dimension_numbers = #tpu.dot_dimension_numbers<[1], [0], [0], [1], [0, 0, 1, 1], [], []>} : vector<16x3xf32>, vector<3x256xf32>, vector<16x256xf32> -> vector<16x256xf32>
    %27 = arith.addf %23, %26 : vector<16x256xf32>
    %c224_i32 = arith.constant 224 : i32
    %28 = tpu.dynamic_rotate %2 by %c224_i32 dim 1 : vector<3x256xf32>, i32 -> vector<3x256xf32>
    %29 = vector.extract_strided_slice %5 {offsets = [0, 18], sizes = [16, 3], strides = [1, 1]} : vector<16x27xf32> to vector<16x3xf32>
    %cst_11 = arith.constant dense<0.000000e+00> : vector<16x256xf32>
    %30 = tpu.matmul %29, %28, %cst_11 {dimension_numbers = #tpu.dot_dimension_numbers<[1], [0], [0], [1], [0, 0, 1, 1], [], []>} : vector<16x3xf32>, vector<3x256xf32>, vector<16x256xf32> -> vector<16x256xf32>
    %31 = arith.addf %27, %30 : vector<16x256xf32>
    %c223_i32 = arith.constant 223 : i32
    %32 = tpu.dynamic_rotate %2 by %c223_i32 dim 1 : vector<3x256xf32>, i32 -> vector<3x256xf32>
    %33 = vector.extract_strided_slice %5 {offsets = [0, 21], sizes = [16, 3], strides = [1, 1]} : vector<16x27xf32> to vector<16x3xf32>
    %cst_12 = arith.constant dense<0.000000e+00> : vector<16x256xf32>
    %34 = tpu.matmul %33, %32, %cst_12 {dimension_numbers = #tpu.dot_dimension_numbers<[1], [0], [0], [1], [0, 0, 1, 1], [], []>} : vector<16x3xf32>, vector<3x256xf32>, vector<16x256xf32> -> vector<16x256xf32>
    %35 = arith.addf %31, %34 : vector<16x256xf32>
    %c222_i32 = arith.constant 222 : i32
    %36 = tpu.dynamic_rotate %2 by %c222_i32 dim 1 : vector<3x256xf32>, i32 -> vector<3x256xf32>
    %37 = vector.extract_strided_slice %5 {offsets = [0, 24], sizes = [16, 3], strides = [1, 1]} : vector<16x27xf32> to vector<16x3xf32>
    %cst_13 = arith.constant dense<0.000000e+00> : vector<16x256xf32>
    %38 = tpu.matmul %37, %36, %cst_13 {dimension_numbers = #tpu.dot_dimension_numbers<[1], [0], [0], [1], [0, 0, 1, 1], [], []>} : vector<16x3xf32>, vector<3x256xf32>, vector<16x256xf32> -> vector<16x256xf32>
    %39 = arith.addf %35, %38 : vector<16x256xf32>
    %c0_14 = arith.constant 0 : index
    %c384 = arith.constant 384 : index
    %40 = vector.load %arg3[%c0_14, %c384] : memref<64x512xf32, #tpu.memory_space<vmem>>, vector<64x8xf32>
    %41 = vector.extract_strided_slice %40 {offsets = [0, 0], sizes = [16, 1], strides = [1, 1]} : vector<64x8xf32> to vector<16x1xf32>
    %42 = vector.extract_strided_slice %40 {offsets = [0, 1], sizes = [16, 1], strides = [1, 1]} : vector<64x8xf32> to vector<16x1xf32>
    %43 = vector.extract_strided_slice %40 {offsets = [0, 2], sizes = [64, 1], strides = [1, 1]} : vector<64x8xf32> to vector<64x1xf32>
    %44 = vector.extract_strided_slice %40 {offsets = [0, 3], sizes = [64, 1], strides = [1, 1]} : vector<64x8xf32> to vector<64x1xf32>
    %45 = vector.extract_strided_slice %40 {offsets = [0, 4], sizes = [64, 2], strides = [1, 1]} : vector<64x8xf32> to vector<64x2xf32>
    %46 = vector.extract_strided_slice %40 {offsets = [0, 6], sizes = [64, 1], strides = [1, 1]} : vector<64x8xf32> to vector<64x1xf32>
    %47 = vector.broadcast %4 : vector<1x256xf32> to vector<16x256xf32>
    %48 = arith.mulf %39, %47 : vector<16x256xf32>
    %cst_15 = arith.constant dense<0.000000e+00> : vector<16xf32>
    %49 = vector.multi_reduction <add>, %48, %cst_15 [1] : vector<16x256xf32> to vector<16xf32>
    %50 = vector.shape_cast %49 : vector<16xf32> to vector<16x1xf32>
    %51 = arith.mulf %48, %39 : vector<16x256xf32>
    %cst_16 = arith.constant dense<0.000000e+00> : vector<16xf32>
    %52 = vector.multi_reduction <add>, %51, %cst_16 [1] : vector<16x256xf32> to vector<16xf32>
    %53 = vector.shape_cast %52 : vector<16xf32> to vector<16x1xf32>
    %54 = arith.mulf %50, %50 : vector<16x1xf32>
    %55 = arith.subf %53, %54 : vector<16x1xf32>
    %cst_17 = arith.constant 0.000000e+00 : f32
    %56 = vector.broadcast %cst_17 : f32 to vector<16x1xf32>
    %57 = arith.maximumf %55, %56 : vector<16x1xf32>
    %cst_18 = arith.constant 9.99999974E-6 : f32
    %58 = vector.broadcast %cst_18 : f32 to vector<16x1xf32>
    %59 = arith.addf %57, %58 : vector<16x1xf32>
    %60 = math.rsqrt %59 : vector<16x1xf32>
    %61 = arith.mulf %60, %41 : vector<16x1xf32>
    %62 = vector.broadcast %61 : vector<16x1xf32> to vector<16x256xf32>
    %63 = arith.mulf %39, %62 : vector<16x256xf32>
    %64 = arith.mulf %50, %61 : vector<16x1xf32>
    %65 = arith.subf %42, %64 : vector<16x1xf32>
    %66 = vector.broadcast %65 : vector<16x1xf32> to vector<16x256xf32>
    %67 = arith.addf %63, %66 : vector<16x256xf32>
    %cst_19 = arith.constant 0.000000e+00 : f32
    %68 = vector.broadcast %cst_19 : f32 to vector<16x256xf32>
    %69 = arith.maximumf %67, %68 : vector<16x256xf32>
    %c0_20 = arith.constant 0 : index
    %c128 = arith.constant 128 : index
    %70 = vector.load %arg3[%c0_20, %c128] : memref<64x512xf32, #tpu.memory_space<vmem>>, vector<64x16xf32>
    %cst_21 = arith.constant dense<0.000000e+00> : vector<64x256xf32>
    %71 = tpu.matmul %70, %69, %cst_21 {dimension_numbers = #tpu.dot_dimension_numbers<[1], [0], [0], [1], [0, 0, 1, 1], [], []>} : vector<64x16xf32>, vector<16x256xf32>, vector<64x256xf32> -> vector<64x256xf32>
    %72 = vector.broadcast %4 : vector<1x256xf32> to vector<64x256xf32>
    %73 = arith.mulf %71, %72 : vector<64x256xf32>
    %cst_22 = arith.constant dense<0.000000e+00> : vector<64xf32>
    %74 = vector.multi_reduction <add>, %73, %cst_22 [1] : vector<64x256xf32> to vector<64xf32>
    %75 = vector.shape_cast %74 : vector<64xf32> to vector<64x1xf32>
    %76 = arith.mulf %73, %71 : vector<64x256xf32>
    %cst_23 = arith.constant dense<0.000000e+00> : vector<64xf32>
    %77 = vector.multi_reduction <add>, %76, %cst_23 [1] : vector<64x256xf32> to vector<64xf32>
    %78 = vector.shape_cast %77 : vector<64xf32> to vector<64x1xf32>
    %79 = arith.mulf %75, %75 : vector<64x1xf32>
    %80 = arith.subf %78, %79 : vector<64x1xf32>
    %cst_24 = arith.constant 0.000000e+00 : f32
    %81 = vector.broadcast %cst_24 : f32 to vector<64x1xf32>
    %82 = arith.maximumf %80, %81 : vector<64x1xf32>
    %cst_25 = arith.constant 9.99999974E-6 : f32
    %83 = vector.broadcast %cst_25 : f32 to vector<64x1xf32>
    %84 = arith.addf %82, %83 : vector<64x1xf32>
    %85 = math.rsqrt %84 : vector<64x1xf32>
    %86 = arith.mulf %85, %43 : vector<64x1xf32>
    %87 = vector.broadcast %86 : vector<64x1xf32> to vector<64x256xf32>
    %88 = arith.mulf %71, %87 : vector<64x256xf32>
    %89 = arith.mulf %75, %86 : vector<64x1xf32>
    %90 = arith.subf %44, %89 : vector<64x1xf32>
    %91 = vector.broadcast %90 : vector<64x1xf32> to vector<64x256xf32>
    %92 = arith.addf %88, %91 : vector<64x256xf32>
    %cst_26 = arith.constant 0.000000e+00 : f32
    %93 = vector.broadcast %cst_26 : f32 to vector<64x256xf32>
    %94 = arith.maximumf %92, %93 : vector<64x256xf32>
    %95 = vector.broadcast %4 : vector<1x256xf32> to vector<64x256xf32>
    %96 = arith.mulf %94, %95 : vector<64x256xf32>
    %cst_27 = arith.constant dense<0.000000e+00> : vector<64xf32>
    %97 = vector.multi_reduction <add>, %96, %cst_27 [1] : vector<64x256xf32> to vector<64xf32>
    %98 = vector.shape_cast %97 : vector<64xf32> to vector<64x1xf32>
    %c0_28 = arith.constant 0 : index
    %c256 = arith.constant 256 : index
    %99 = vector.load %arg3[%c0_28, %c256] : memref<64x512xf32, #tpu.memory_space<vmem>>, vector<64x64xf32>
    %cst_29 = arith.constant dense<0.000000e+00> : vector<64x1xf32>
    %100 = tpu.matmul %99, %98, %cst_29 {dimension_numbers = #tpu.dot_dimension_numbers<[1], [0], [0], [1], [0, 0, 1, 1], [], []>} : vector<64x64xf32>, vector<64x1xf32>, vector<64x1xf32> -> vector<64x1xf32>
    %cst_30 = arith.constant dense<0.000000e+00> : vector<64x1xf32>
    %101 = tpu.matmul %45, %3, %cst_30 {dimension_numbers = #tpu.dot_dimension_numbers<[1], [0], [0], [1], [0, 0, 1, 1], [], []>} : vector<64x2xf32>, vector<2x1xf32>, vector<64x1xf32> -> vector<64x1xf32>
    %102 = arith.addf %100, %101 : vector<64x1xf32>
    %103 = arith.addf %102, %46 : vector<64x1xf32>
    %104 = vector.extract_strided_slice %103 {offsets = [0, 0], sizes = [4, 1], strides = [1, 1]} : vector<64x1xf32> to vector<4x1xf32>
    %c0_31 = arith.constant 0 : index
    %c0_32 = arith.constant 0 : index
    %c0_33 = arith.constant 0 : index
    %105 = vector.load %arg4[%c0_31, %c0_32, %c0_33] : memref<1x4x1xf32, #tpu.memory_space<vmem>>, vector<1x4x1xf32>
    %106 = vector.shape_cast %105 : vector<1x4x1xf32> to vector<4x1xf32>
    %107 = vector.shape_cast %104 : vector<4x1xf32> to vector<1x4x1xf32>
    tpu.vector_store %arg4[%c0_31, %c0_32, %c0_33], %107 {strides = array<i32>} : memref<1x4x1xf32, #tpu.memory_space<vmem>>, vector<1x4x1xf32>,
    return
  }
  func.func @transform_0(%arg0: i32) -> (i32, i32, i32) {
    %c0_i32 = arith.constant 0 : i32
    %c0_i32_0 = arith.constant 0 : i32
    %c0_i32_1 = arith.constant 0 : i32
    return %arg0, %c0_i32, %c0_i32_0 : i32, i32, i32
  }
  func.func @transform_1(%arg0: i32) -> (i32, i32) {
    %c0_i32 = arith.constant 0 : i32
    %c0_i32_0 = arith.constant 0 : i32
    %c0_i32_1 = arith.constant 0 : i32
    return %c0_i32, %c0_i32_0 : i32, i32
  }
  func.func @transform_2(%arg0: i32) -> (i32, i32) {
    %c0_i32 = arith.constant 0 : i32
    %c0_i32_0 = arith.constant 0 : i32
    %c0_i32_1 = arith.constant 0 : i32
    return %c0_i32, %c0_i32_0 : i32, i32
  }
  func.func @transform_3(%arg0: i32) -> (i32, i32, i32) {
    %c0_i32 = arith.constant 0 : i32
    %c0_i32_0 = arith.constant 0 : i32
    %c0_i32_1 = arith.constant 0 : i32
    return %arg0, %c0_i32, %c0_i32_0 : i32, i32, i32
  }
}

</mosaic_0001>

<bundles_post_ra>
// kernel: dqn_forward.1
= control target key start
LH: loop header
LB: loop body
LE: loop exit
PB: predicated region body
PF: predicated region fallthrough
CT: control target
= control target key end

     0   :  { %s2248_s12 = smov 0   ;;  %s2725_s0 = inlined_call_operand.vmem [shape: f32[4,5,256], index: 0, kind: input, shape index: {}]   ;;  %s2726_s1 = inlined_call_operand.vmem [shape: f32[1,256], index: 1, kind: input, shape index: {}]   ;;  %s2727_s2 = inlined_call_operand.vmem [shape: f32[64,512], index: 2, kind: input, shape index: {}]   ;;  %s2728_s3 = inlined_call_operand.vmem [shape: f32[4,4,1], index: 3, kind: output, shape index: {}]  }
   0x1 LB: > { %s1997_s13 = sadd.s32 4294967295, %s2204_s12   ;;  %p2001_p0 = scmp.ge.s32.totalorder %s2204_s12, 1  ;;  %s2204_s12 = sphi %s2248_s12, %s13_s12  }
   0x2   : > { %p137_p1 = scmp.lt.s32.totalorder %s2204_s12, 5 }
   0x4   : > { %p138_p2 = pnand %p2001_p0, %p137_p1 }
   0x5   : > { %p160_p3 = scmp.lt.s32.totalorder (!%p138_p2), %s1997_s13, 3  ;;  %s2206_s16 = smov (!%p138_p2), 125  }
   0x6   : > { %141 = sbr.rel (%p138_p2) target bundleno = 1937 (0x791), region = 32  ;;  %s2208_s23 = smov (!%p138_p2), 127  }
   0x7   : > { %s2209_s24 = smov (!%p138_p2), 126   ;;  %s2210_s25 = smov (!%p138_p2), 112  }
   0x8   : > { %s2211_s26 = smov (!%p138_p2), 122   ;;  %s2212_s27 = smov (!%p138_p2), 111  }
   0x9   : > { %s2213_s28 = smov (!%p138_p2), 116   ;;  %s2214_s29 = smov (!%p138_p2), 110  }
   0xa   : > { %s2215_s30 = smov (!%p138_p2), 119   ;;  %s2216_s4 = smov (!%p138_p2), 96  }
   0xb   : > { %v2259_v0 = vld [vmem:[%s2727_s2 + $0x20] sm:$0xff]  ;;  %s2730_s13 = smov (!%p160_p3, %s1997_s13), 3  ;;  %v2207_v2 = vmov 0.0   ;;  %s2217_s5 = smov 95   ;;  %v178_v6 = vlaneseq  ;;  %vm194_vm1 = vcmask 1042432   ;;  %vm189_vm2 = vcmask 23552  }
   0xc   : > { %187 = vrot.lane.b32.xlu1 %v2259_v0, %s2206_s16  ;;  %v2267_v1 = vld [vmem:[%s2727_s2] sm:$0xff]  ;;  %265 = vmatprep.mubr.f32.mxu0 %v2207_v2  ;;  %s2068_s19 = sshll.u32 %s2730_s13, 4  ;;  %s2218_s6 = smov 113   ;;  %vm1182_vm10 = vcmask 130048   ;;  %vm1714_vm11 = vcmask 1041408   ;;  %vm1697_vm12 = vcmask 15360  }
   0xd   : > { %271 = vmatprep.mubr.f32.mxu1 %v2207_v2  ;;  %s2275_s22 = scalar_lea.vmem %s2725_s0, %s2068_s19  ;;  %s2219_s7 = smov 94   ;;  %v2317_v8 = vand.u32 127, %v178_v6  ;;  %vm1815_vm13 = vcmask 523264   ;;  %vm1942_vm14 = vcmask 3072  }
   0xe   : > { %v2279_v3 = vld [vmem:[%s2275_s22] sm:$0x1f]  ;;  %v2283_v4 = vld [vmem:[%s2275_s22 + $0x8] sm:$0x1f]  ;;  %s2220_s8 = smov 104   ;;  %s2221_s9 = smov 107  }
   0xf   : > { %174 = vrot.lane.b32.xlu0 %v2279_v3, %s2208_s23  ;;  %vm180_vm0 = vcmp.lt.s32.totalorder %v2317_v8, 127  ;;  %vm369_vm3 = vcmp.lt.s32.totalorder %v2317_v8, 126  ;;  %vm471_vm4 = vcmp.lt.s32.totalorder %v2317_v8, 112  ;;  %vm573_vm5 = vcmp.lt.s32.totalorder %v2317_v8, 111  ;;  %s2224_s18 = smov 1  }
  0x10   : > { %185 = vrot.lane.b32.xlu1 %v2267_v1, %s2206_s16  ;;  %vm675_vm6 = vcmp.lt.s32.totalorder %v2317_v8, 110  ;;  %vm777_vm7 = vcmp.lt.s32.totalorder %v2317_v8, 96  ;;  %vm879_vm8 = vcmp.lt.s32.totalorder %v2317_v8, 95  ;;  %vm981_vm9 = vcmp.lt.s32.totalorder %v2317_v8, 94  ;;  %s2004_s16 = sshll.u32 %s2730_s13, 2 }
  0x11   : > { %s168_s20 = scalar_lea.vmem %s2728_s3, %s2004_s16 }
  0x13   : > { %176 = vrot.lane.b32.xlu0 %v2283_v4, %s2208_s23 }
  0x14   : > { %367 = vrot.lane.b32.xlu1 %v2283_v4, %s2209_s24 }
  0x17   : > { %365 = vrot.lane.b32.xlu0 %v2279_v3, %s2209_s24 }
  0x18   : > { %467 = vrot.lane.b32.xlu1 %v2279_v3, %s2210_s25 }
  0x1b   : > { %372 = vrot.lane.b32.xlu0 %v2267_v1, %s2211_s26 }
  0x1c   : > { %374 = vrot.lane.b32.xlu1 %v2259_v0, %s2211_s26 }
  0x1f   : > { %469 = vrot.lane.b32.xlu0 %v2283_v4, %s2210_s25 }
  0x20   : > { %571 = vrot.lane.b32.xlu1 %v2283_v4, %s2212_s27 }
  0x23   : > { %569 = vrot.lane.b32.xlu0 %v2279_v3, %s2212_s27 }
  0x24   : > { %576 = vrot.lane.b32.xlu1 %v2267_v1, %s2213_s28 }
  0x27   : > { %474 = vrot.lane.b32.xlu0 %v2267_v1, %s2215_s30 }
  0x28   : > { %671 = vrot.lane.b32.xlu1 %v2279_v3, %s2214_s29 }
  0x2b   : > { %476 = vrot.lane.b32.xlu0 %v2259_v0, %s2215_s30 }
  0x2c   : > { %578 = vrot.lane.b32.xlu1 %v2259_v0, %s2213_s28 }
  0x2f   : > { %673 = vrot.lane.b32.xlu0 %v2283_v4, %s2214_s29 }
  0x30   : > { %775 = vrot.lane.b32.xlu1 %v2283_v4, %s2216_s4 }
  0x33   : > { %773 = vrot.lane.b32.xlu0 %v2279_v3, %s2216_s4 }
  0x34   : > { %780 = vrot.lane.b32.xlu1 %v2267_v1, %s2214_s29 }
  0x37   : > { %678 = vrot.lane.b32.xlu0 %v2267_v1, %s2218_s6 }
  0x38   : > { %875 = vrot.lane.b32.xlu1 %v2279_v3, %s2217_s5 }
  0x3b   : > { %680 = vrot.lane.b32.xlu0 %v2259_v0, %s2218_s6 }
  0x3c   : > { %782 = vrot.lane.b32.xlu1 %v2259_v0, %s2214_s29 }
  0x3f   : > { %877 = vrot.lane.b32.xlu0 %v2283_v4, %s2217_s5 }
  0x40   : > { %979 = vrot.lane.b32.xlu1 %v2283_v4, %s2219_s7 }
  0x43   : > { %977 = vrot.lane.b32.xlu0 %v2279_v3, %s2219_s7 }
  0x44   : > { %984 = vrot.lane.b32.xlu1 %v2267_v1, %s2220_s8 }
  0x47   : > { %882 = vrot.lane.b32.xlu0 %v2267_v1, %s2221_s9 }
  0x48   : > { %986 = vrot.lane.b32.xlu1 %v2259_v0, %s2220_s8 }
  0x4b   : > { %884 = vrot.lane.b32.xlu0 %v2259_v0, %s2221_s9 }
  0x7e   : > { %v188_v5 = vpop.permute.xlu1 %187 }
  0x81   : > { %v175_v9 = vpop.permute.xlu0 %174 }
  0x82   : > { %v186_v7 = vpop.permute.xlu1 %185 }
  0x85   : > { %v177_v11 = vpop.permute.xlu0 %176 }
  0x86   : > { %v368_v10 = vpop.permute.xlu1 %367  ;;  %v182_v12 = vsel %vm180_vm0, %v177_v11, %v175_v9  ;;  %v181_v13 = vsel %vm180_vm0, %v175_v9, %v177_v11 }
  0x87   : > { %2005 = vmatprep.subr.msk.mxu0 %vm194_vm1, %v182_v12  ;;  %2136 = vmatprep.subr.msk.mxu1 %vm194_vm1, %v182_v12 }
  0x88   : > { %2006 = vmatpush1.msk.msra.mxu0 %vm194_vm1, %v181_v13  ;;  %2137 = vmatpush1.msk.msra.mxu1 %vm194_vm1, %v181_v13 }
  0x89   : > { %2007 = vmatmul.mubr.msk.f32.vlgmr.msra.gmra.mxu0 %vm189_vm2, %v186_v7  ;;  %2008 = vmatmul.mubr.msk.f32.vlgmr.msra.gmra.mxu1 %vm189_vm2, %v188_v5  ;;  %v366_v15 = vpop.permute.xlu0 %365 }
  0x8a   : > { %v468_v14 = vpop.permute.xlu1 %467  ;;  %v370_v16 = vsel %vm369_vm3, %v366_v15, %v368_v10  ;;  %v371_v17 = vsel %vm369_vm3, %v368_v10, %v366_v15  ;;  %2009 = vmatprep.subr.msk.mxu1 %vm194_vm1, %v2283_v4  ;;  %352 = vmatprep.mubr.f32.mxu1 %v2207_v2 }
  0x8b   : > { %2013 = vmatprep.subr.msk.mxu0 %vm194_vm1, %v371_v17  ;;  %2010 = vmatpush1.msk.msra.mxu1 %vm194_vm1, %v2279_v3 }
  0x8c   : > { %2014 = vmatpush1.msk.msra.mxu0 %vm194_vm1, %v370_v16  ;;  %450 = vmatprep.mubr.f32.mxu0 %v2207_v2 }
  0x8d   : > { %2011 = vmatmul.mubr.msk.f32.vlgmr.msra.gmra.mxu1 %vm189_vm2, %v2267_v1  ;;  %v373_v19 = vpop.permute.xlu0 %372 }
  0x8e   : > { %v375_v18 = vpop.permute.xlu1 %374  ;;  %2015 = vmatmul.mubr.msk.f32.vlgmr.msra.gmra.mxu0 %vm189_vm2, %v373_v19  ;;  %358 = vmatprep.mubr.f32.mxu1 %v2207_v2 }
  0x8f   : > { %456 = vmatprep.mubr.f32.mxu0 %v2207_v2 }
  0x91   : > { %2012 = vmatmul.mubr.msk.f32.gmra.mxu1 %vm189_vm2, %v2259_v0  ;;  %v470_v21 = vpop.permute.xlu0 %469 }
  0x92   : > { %v572_v20 = vpop.permute.xlu1 %571  ;;  %v472_v22 = vsel %vm471_vm4, %v468_v14, %v470_v21  ;;  %v473_v23 = vsel %vm471_vm4, %v470_v21, %v468_v14  ;;  %2016 = vmatmul.mubr.msk.f32.gmra.mxu0 %vm189_vm2, %v375_v18  ;;  %552 = vmatprep.mubr.f32.mxu1 %v2207_v2 }
  0x93   : > { %2017 = vmatprep.subr.msk.mxu1 %vm194_vm1, %v473_v23  ;;  %654 = vmatprep.mubr.f32.mxu0 %v2207_v2 }
  0x94   : > { %2018 = vmatpush1.msk.msra.mxu1 %vm194_vm1, %v472_v22 }
  0x95   : > { %v570_v25 = vpop.permute.xlu0 %569 }
  0x96   : > { %v577_v24 = vpop.permute.xlu1 %576  ;;  %v574_v26 = vsel %vm573_vm5, %v570_v25, %v572_v20  ;;  %v575_v27 = vsel %vm573_vm5, %v572_v20, %v570_v25 }
  0x97   : > { %2021 = vmatprep.subr.msk.mxu0 %vm194_vm1, %v575_v27 }
  0x98   : > { %2022 = vmatpush1.msk.msra.mxu0 %vm194_vm1, %v574_v26 }
  0x99   : > { %2023 = vmatmul.mubr.msk.f32.vlgmr.msra.gmra.mxu0 %vm189_vm2, %v577_v24  ;;  %v475_v29 = vpop.permute.xlu0 %474 }
  0x9a   : > { %v672_v28 = vpop.permute.xlu1 %671  ;;  %2019 = vmatmul.mubr.msk.f32.vlgmr.msra.gmra.mxu1 %vm189_vm2, %v475_v29  ;;  %660 = vmatprep.mubr.f32.mxu0 %v2207_v2 }
  0x9b   : > { %558 = vmatprep.mubr.f32.mxu1 %v2207_v2 }
  0x9d   : > { %v477_v31 = vpop.permute.xlu0 %476 }
  0x9e   : > { %v579_v30 = vpop.permute.xlu1 %578  ;;  %2020 = vmatmul.mubr.msk.f32.gmra.mxu1 %vm189_vm2, %v477_v31 }
  0x9f   : > { %2024 = vmatmul.mubr.msk.f32.gmra.mxu0 %vm189_vm2, %v579_v30  ;;  %756 = vmatprep.mubr.f32.mxu1 %v2207_v2  ;;  %v1089_v30 = vshrl.u32 %v178_v6, 7 }
  0xa0   : > { %858 = vmatprep.mubr.f32.mxu0 %v2207_v2 }
  0xa1   : > { %v674_v33 = vpop.permute.xlu0 %673 }
  0xa2   : > { %v776_v32 = vpop.permute.xlu1 %775  ;;  %v676_v34 = vsel %vm675_vm6, %v672_v28, %v674_v33  ;;  %v677_v35 = vsel %vm675_vm6, %v674_v33, %v672_v28 }
  0xa3   : > { %2025 = vmatprep.subr.msk.mxu1 %vm194_vm1, %v677_v35 }
  0xa4   : > { %2026 = vmatpush1.msk.msra.mxu1 %vm194_vm1, %v676_v34 }
  0xa5   : > { %v774_v37 = vpop.permute.xlu0 %773 }
  0xa6   : > { %v781_v36 = vpop.permute.xlu1 %780  ;;  %v778_v38 = vsel %vm777_vm7, %v774_v37, %v776_v32  ;;  %v779_v39 = vsel %vm777_vm7, %v776_v32, %v774_v37 }
  0xa7   : > { %2029 = vmatprep.subr.msk.mxu0 %vm194_vm1, %v779_v39 }
  0xa8   : > { %2030 = vmatpush1.msk.msra.mxu0 %vm194_vm1, %v778_v38  ;;  %v1090_v38 = vsub.s32 0, %v1089_v30 }
  0xa9   : > { %2031 = vmatmul.mubr.msk.f32.vlgmr.msra.gmra.mxu0 %vm189_vm2, %v781_v36  ;;  %v679_v41 = vpop.permute.xlu0 %678 }
  0xaa   : > { %v876_v40 = vpop.permute.xlu1 %875  ;;  %2027 = vmatmul.mubr.msk.f32.vlgmr.msra.gmra.mxu1 %vm189_vm2, %v679_v41  ;;  %864 = vmatprep.mubr.f32.mxu0 %v2207_v2  ;;  %v1094_v41 = vsub.s32 1, %v1089_v30  ;;  %v2409_v30 = vld [vmem:[%s2727_s2 + $0x38] sm:$0xff] }
  0xab   : > { %762 = vmatprep.mubr.f32.mxu1 %v2207_v2 }
  0xad   : > { %v681_v43 = vpop.permute.xlu0 %680 }
  0xae   : > { %v783_v42 = vpop.permute.xlu1 %782  ;;  %2028 = vmatmul.mubr.msk.f32.gmra.mxu1 %vm189_vm2, %v681_v43 }
  0xaf   : > { %2032 = vmatmul.mubr.msk.f32.gmra.mxu0 %vm189_vm2, %v783_v42  ;;  %960 = vmatprep.mubr.f32.mxu1 %v2207_v2 }
  0xb0   : > { %1062 = vmatprep.mubr.f32.mxu0 %v2207_v2 }
  0xb1   : > { %v878_v45 = vpop.permute.xlu0 %877 }
  0xb2   : > { %v980_v44 = vpop.permute.xlu1 %979  ;;  %v880_v46 = vsel %vm879_vm8, %v876_v40, %v878_v45  ;;  %v881_v47 = vsel %vm879_vm8, %v878_v45, %v876_v40  ;;  %v171_v40 = vld [vmem:[%s2726_s1] sm:$0x3] }
  0xb3   : > { %2033 = vmatprep.subr.msk.mxu1 %vm194_vm1, %v881_v47 }
  0xb4   : > { %2034 = vmatpush1.msk.msra.mxu1 %vm194_vm1, %v880_v46 }
  0xb5   : > { %v978_v49 = vpop.permute.xlu0 %977 }
  0xb6   : > { %v985_v48 = vpop.permute.xlu1 %984  ;;  %v982_v50 = vsel %vm981_vm9, %v978_v49, %v980_v44  ;;  %v983_v51 = vsel %vm981_vm9, %v980_v44, %v978_v49 }
  0xb7   : > { %2037 = vmatprep.subr.msk.mxu0 %vm194_vm1, %v983_v51 }
  0xb8   : > { %2038 = vmatpush1.msk.msra.mxu0 %vm194_vm1, %v982_v50  ;;  %v2390_v50 = vrot.slane %v171_v40, %v1090_v38 }
  0xb9   : > { %v883_v52 = vpop.permute.xlu0 %882  ;;  %2039 = vmatmul.mubr.msk.f32.vlgmr.msra.gmra.mxu0 %vm189_vm2, %v985_v48 }
  0xba   : > { %2035 = vmatmul.mubr.msk.f32.vlgmr.msra.gmra.mxu1 %vm189_vm2, %v883_v52  ;;  %v987_v53 = vpop.permute.xlu1 %986  ;;  %1068 = vmatprep.mubr.f32.mxu0 %v2207_v2  ;;  %v2392_v52 = vrot.slane %v171_v40, %v1094_v41 }
  0xbb   : > { %966 = vmatprep.mubr.f32.mxu1 %v2207_v2 }
  0xbd   : > { %v885_v54 = vpop.permute.xlu0 %884  ;;  %2040 = vmatmul.mubr.msk.f32.gmra.mxu0 %vm189_vm2, %v987_v53 }
  0xbe   : > { %2036 = vmatmul.mubr.msk.f32.gmra.mxu1 %vm189_vm2, %v885_v54 }
  0xbf   : > { %1271 = vmatprep.mubr.f32.mxu1 %v2207_v2 }
 0x149   : > { %v273_v55 = vpop.f32.mrf.mxu1  ;;  %v267_v56 = vpop.f32.mrf.mxu0 }
 0x14b   : > { %v275_v57 = vpop.f32.mrf.mxu1  ;;  %v269_v58 = vpop.f32.mrf.mxu0 }
 0x14d   : > { %v354_v59 = vpop.f32.mrf.mxu1 }
 0x14e   : > { %v452_v60 = vpop.f32.mrf.mxu0  ;;  %v355_v11 = vadd.f32 %v354_v59, %v267_v56 }
 0x14f   : > { %v356_v61 = vpop.f32.mrf.mxu1 }
 0x150   : > { %v454_v62 = vpop.f32.mrf.mxu0  ;;  %v357_v13 = vadd.f32 %v356_v61, %v269_v58  ;;  %v463_v16 = vadd.f32 %v452_v60, %v355_v11 }
 0x151   : > { %v360_v63 = vpop.f32.mrf.mxu1 }
 0x152   : > { %v458_v0 = vpop.f32.mrf.mxu0  ;;  %v361_v17 = vadd.f32 %v360_v63, %v273_v55  ;;  %v464_v19 = vadd.f32 %v454_v62, %v357_v13 }
 0x153   : > { %v362_v1 = vpop.f32.mrf.mxu1 }
 0x154   : > { %v460_v4 = vpop.f32.mrf.mxu0  ;;  %v363_v20 = vadd.f32 %v362_v1, %v275_v57  ;;  %v465_v23 = vadd.f32 %v458_v0, %v361_v17 }
 0x156   : > { %v466_v26 = vadd.f32 %v460_v4, %v363_v20 }
 0x159   : > { %v656_v5 = vpop.f32.mrf.mxu0 }
 0x15a   : > { %v554_v3 = vpop.f32.mrf.mxu1 }
 0x15b   : > { %v658_v8 = vpop.f32.mrf.mxu0  ;;  %v565_v21 = vadd.f32 %v554_v3, %v463_v16  ;;  %v2222_v16 = vmov 0  }
 0x15c   : > { %v556_v7 = vpop.f32.mrf.mxu1  ;;  %2168 = vset.pattern.permute.xlu1 %v2222_v16 }
 0x15d   : > { %v566_v24 = vadd.f32 %v556_v7, %v464_v19  ;;  %v667_v28 = vadd.f32 %v656_v5, %v565_v21 }
 0x15e   : > { %v560_v9 = vpop.f32.mrf.mxu1 }
 0x15f   : > { %v662_v10 = vpop.f32.mrf.mxu0  ;;  %v567_v27 = vadd.f32 %v560_v9, %v465_v23  ;;  %v668_v34 = vadd.f32 %v658_v8, %v566_v24 }
 0x160   : > { %v562_v12 = vpop.f32.mrf.mxu1 }
 0x161   : > { %v664_v14 = vpop.f32.mrf.mxu0  ;;  %v568_v32 = vadd.f32 %v562_v12, %v466_v26  ;;  %v669_v35 = vadd.f32 %v662_v10, %v567_v27 }
 0x163   : > { %v670_v42 = vadd.f32 %v664_v14, %v568_v32 }
 0x169   : > { %v860_v18 = vpop.f32.mrf.mxu0 }
 0x16a   : > { %v758_v15 = vpop.f32.mrf.mxu1 }
 0x16b   : > { %v862_v25 = vpop.f32.mrf.mxu0  ;;  %v769_v33 = vadd.f32 %v758_v15, %v667_v28 }
 0x16c   : > { %v760_v22 = vpop.f32.mrf.mxu1 }
 0x16d   : > { %v770_v36 = vadd.f32 %v760_v22, %v668_v34  ;;  %v871_v44 = vadd.f32 %v860_v18, %v769_v33  ;;  %v2415_v33 = vld [vmem:[%s2727_s2 + $0x18] sm:$0xff] }
 0x16e   : > { %v764_v31 = vpop.f32.mrf.mxu1 }
 0x16f   : > { %v866_v29 = vpop.f32.mrf.mxu0  ;;  %v771_v43 = vadd.f32 %v764_v31, %v669_v35  ;;  %v872_v48 = vadd.f32 %v862_v25, %v770_v36 }
 0x170   : > { %v766_v39 = vpop.f32.mrf.mxu1 }
 0x171   : > { %v868_v37 = vpop.f32.mrf.mxu0  ;;  %v772_v6 = vadd.f32 %v766_v39, %v670_v42  ;;  %v873_v53 = vadd.f32 %v866_v29, %v771_v43  ;;  %v2223_v29 = vmov 1  }
 0x172   : > { %2169 = vset.pattern.permute.xlu0 %v2223_v29 }
 0x173   : > { %v874_v58 = vadd.f32 %v868_v37, %v772_v6 }
 0x179   : > { %v1064_v45 = vpop.f32.mrf.mxu0 }
 0x17a   : > { %v962_v46 = vpop.f32.mrf.mxu1 }
 0x17b   : > { %v973_v47 = vadd.f32 %v962_v46, %v871_v44  ;;  %v1066_v49 = vpop.f32.mrf.mxu0 }
 0x17c   : > { %v964_v51 = vpop.f32.mrf.mxu1 }
 0x17d   : > { %v2394_v54 = vadd.f32 %v1064_v45, %v973_v47  ;;  %v974_v55 = vadd.f32 %v964_v51, %v872_v48  ;;  %v1070_v57 = vpop.f32.mrf.mxu0 }
 0x17e   : > { %v968_v56 = vpop.f32.mrf.mxu1 }
 0x17f   : > { %v2396_v59 = vadd.f32 %v1066_v49, %v974_v55  ;;  %v975_v60 = vadd.f32 %v968_v56, %v873_v53  ;;  %v1098_v0 = vmul.f32 %v2390_v50, %v2394_v54  ;;  %v1072_v3 = vpop.f32.mrf.mxu0 }
 0x180   : > { %v970_v61 = vpop.f32.mrf.mxu1 }
 0x181   : > { %v1077_v62 = vadd.f32 %v1070_v57, %v975_v60  ;;  %v976_v63 = vadd.f32 %v970_v61, %v874_v58  ;;  %v1099_v1 = vmul.f32 %v2392_v52, %v2396_v59  ;;  %v1108_v14 = vmul.f32 %v1098_v0, %v2394_v54  ;;  %v1174_v61 = vld [vmem:[%s2727_s2 + $0x8] sm:$0xff] }
 0x183   : > { %v1078_v4 = vadd.f32 %v1072_v3, %v976_v63  ;;  %v1102_v5 = vadd.f32 %v1099_v1, %v1098_v0  ;;  %v1100_v7 = vmul.f32 %v2390_v50, %v1077_v62  ;;  %v1109_v13 = vmul.f32 %v1099_v1, %v2396_v59  ;;  %v1178_v63 = vld [vmem:[%s2727_s2 + $0x88] sm:$0xff] }
 0x184   : > { %v1179_v0 = vld [vmem:[%s2727_s2 + $0xa8] sm:$0xff] }
 0x185   : > { %1103 = vadd.xlane.f32.xlu1 %v1102_v5  ;;  %v1101_v8 = vmul.f32 %v2392_v52, %v1078_v4  ;;  %v1110_v11 = vmul.f32 %v1100_v7, %v1077_v62  ;;  %v1112_v15 = vadd.f32 %v1109_v13, %v1108_v14  ;;  %v1180_v1 = vld [vmem:[%s2727_s2 + $0xc8] sm:$0xff] }
 0x186   : > { %v1181_v3 = vld [vmem:[%s2727_s2 + $0xe8] sm:$0xff] }
 0x187   : > { %v1105_v9 = vadd.f32 %v1101_v8, %v1100_v7  ;;  %v1111_v10 = vmul.f32 %v1101_v8, %v1078_v4 }
 0x189   : > { %1106 = vadd.xlane.f32.xlu0 %v1105_v9  ;;  %v1115_v12 = vadd.f32 %v1111_v10, %v1110_v11 }
 0x18d   : > { %1116 = vadd.xlane.f32.xlu0 %v1115_v12 }
 0x191   : > { %1113 = vadd.xlane.f32.xlu0 %v1112_v15 }
 0x20e   : > { %v1104_v19 = vpop.xlane.xlu1 %1103 }
 0x20f   : > { %v1118_v22 = vmul.f32 %v1104_v19, %v1104_v19 }
 0x212   : > { %v1107_v17 = vpop.xlane.xlu0 %1106 }
 0x213   : > { %v1119_v18 = vmul.f32 %v1107_v17, %v1107_v17 }
 0x216   : > { %v1117_v20 = vpop.xlane.xlu0 %1116 }
 0x217   : > { %v1121_v21 = vsub.f32 %v1117_v20, %v1119_v18 }
 0x219   : > { %v1123_v23 = vmax.f32 %v1121_v21, 0.0 }
 0x21a   : > { %v1114_v24 = vpop.xlane.xlu0 %1113 }
 0x21b   : > { %v1125_v25 = vadd.f32 1e-05, %v1123_v23  ;;  %v1120_v26 = vsub.f32 %v1114_v24, %v1118_v22 }
 0x21d   : > { %2177 = vrsqrt.f32 %v1125_v25  ;;  %v1122_v27 = vmax.f32 %v1120_v26, 0.0 }
 0x21f   : > { %v1124_v28 = vadd.f32 1e-05, %v1122_v27 }
 0x221   : > { %2179 = vrsqrt.f32 %v1124_v28 }
 0x22a   : > { %v2178_v31 = vpop.eup %2177 }
 0x22b   : > { %v1129_v32 = vmul.f32 %v2178_v31, %v2409_v30 }
 0x22d   : > { %v1145_v34 = vmul.f32 %v1129_v32, %v1107_v17 }
 0x22e   : > { %v2180_v35 = vpop.eup %2179 }
 0x22f   : > { %1150 = vrot.lane.b32.xlu1 %v1145_v34, %s2224_s18  ;;  %v1128_v36 = vmul.f32 %v2180_v35, %v2415_v33 }
 0x231   : > { %v1144_v37 = vmul.f32 %v1128_v36, %v1104_v19 }
 0x233   : > { %1137 = vperm.xlu1 %2168, %v1129_v32   ;;  %1148 = vrot.lane.b32.xlu0 %v1144_v37, %s2224_s18 }
 0x237   : > { %1132 = vperm.xlu1 %2168, %v1128_v36  }
 0x23b   : > { %2170 = vset.pattern.permute.xlu1 %v2223_v29 }
 0x2a1   : > { %v1151_v38 = vpop.permute.xlu1 %1150 }
 0x2a2   : > { %v1155_v39 = vsub.f32 %v2409_v30, %v1151_v38 }
 0x2a4   : > { %1163 = vperm.xlu0 %2169, %v1155_v39  }
 0x2a5   : > { %v1149_v40 = vpop.permute.xlu0 %1148 }
 0x2a6   : > { %v1154_v41 = vsub.f32 %v2415_v33, %v1149_v40 }
 0x2a8   : > { %1158 = vperm.xlu1 %2170, %v1154_v41  }
 0x2ae   : > { %v1138_v42 = vpop.permute.xlu1 %1137 }
 0x2af   : > { %v1142_v43 = vmul.f32 %v1138_v42, %v1077_v62  ;;  %v1143_v44 = vmul.f32 %v1138_v42, %v1078_v4  ;;  %v1177_v62 = vld [vmem:[%s2727_s2 + $0x68] sm:$0xff] }
 0x2b2   : > { %v1133_v45 = vpop.permute.xlu1 %1132 }
 0x2b3   : > { %v1140_v48 = vmul.f32 %v1133_v45, %v2394_v54  ;;  %v1141_v49 = vmul.f32 %v1133_v45, %v2396_v59  ;;  %v1175_v54 = vld [vmem:[%s2727_s2 + $0x28] sm:$0xff] }
 0x2b4   : > { %v1176_v59 = vld [vmem:[%s2727_s2 + $0x48] sm:$0xff] }
 0x31f   : > { %v1164_v46 = vpop.permute.xlu0 %1163 }
 0x320   : > { %v1168_v6 = vadd.f32 %v1164_v46, %v1142_v43  ;;  %v1169_v47 = vadd.f32 %v1164_v46, %v1143_v44 }
 0x322   : > { %v1172_v51 = vmax.f32 %v1168_v6, 0.0  ;;  %v1173_v53 = vmax.f32 %v1169_v47, 0.0 }
 0x323   : > { %v1159_v55 = vpop.permute.xlu1 %1158 }
 0x324   : > { %v1166_v56 = vadd.f32 %v1159_v55, %v1140_v48  ;;  %v1167_v57 = vadd.f32 %v1159_v55, %v1141_v49  ;;  %1235 = vmatprep.subr.mxu1 %v1173_v53 }
 0x325   : > { %1236 = vmatpush1.msra.mxu1 %v1172_v51 }
 0x326   : > { %v1170_v58 = vmax.f32 %v1166_v56, 0.0  ;;  %v1171_v60 = vmax.f32 %v1167_v57, 0.0 }
 0x328   : > { %1237 = vmatprep.subr.mxu1 %v1171_v60 }
 0x329   : > { %1238 = vmatpush1.msra.mxu1 %v1170_v58 }
 0x32a   : > { %2041 = vmatmul.mubr.msk.f32.vlgmr.msra.gmra.mxu1 %vm1182_vm10, %v1174_v61 }
 0x32b   : > { %1277 = vmatprep.mubr.f32.mxu1 %v2207_v2 }
 0x32e   : > { %2042 = vmatmul.mubr.msk.f32.gmra.mxu1 %vm1182_vm10, %v1175_v54 }
 0x32f   : > { %1283 = vmatprep.mubr.f32.mxu1 %v2207_v2 }
 0x332   : > { %2043 = vmatmul.mubr.msk.f32.gmra.mxu1 %vm1182_vm10, %v1176_v59 }
 0x333   : > { %1289 = vmatprep.mubr.f32.mxu1 %v2207_v2 }
 0x336   : > { %2044 = vmatmul.mubr.msk.f32.gmra.mxu1 %vm1182_vm10, %v1177_v62 }
 0x337   : > { %1295 = vmatprep.mubr.f32.mxu1 %v2207_v2 }
 0x33a   : > { %2045 = vmatmul.mubr.msk.f32.gmra.mxu1 %vm1182_vm10, %v1178_v63 }
 0x33b   : > { %1301 = vmatprep.mubr.f32.mxu1 %v2207_v2 }
 0x33e   : > { %2046 = vmatmul.mubr.msk.f32.gmra.mxu1 %vm1182_vm10, %v1179_v0 }
 0x33f   : > { %1307 = vmatprep.mubr.f32.mxu1 %v2207_v2 }
 0x342   : > { %2047 = vmatmul.mubr.msk.f32.gmra.mxu1 %vm1182_vm10, %v1180_v1 }
 0x343   : > { %1313 = vmatprep.mubr.f32.mxu1 %v2207_v2 }
 0x346   : > { %2048 = vmatmul.mubr.msk.f32.gmra.mxu1 %vm1182_vm10, %v1181_v3 }
 0x3ea   : > { %v2463_v4 = vpop.f32.mrf.mxu1 }
 0x3eb   : > { %v1320_v54 = vmul.f32 %v2463_v4, %v2390_v50 }
 0x3ec   : > { %v2465_v5 = vpop.f32.mrf.mxu1 }
 0x3ed   : > { %v1321_v60 = vmul.f32 %v2465_v5, %v2392_v52  ;;  %v1360_v3 = vmul.f32 %v1320_v54, %v2463_v4 }
 0x3ee   : > { %v2467_v7 = vpop.f32.mrf.mxu1 }
 0x3ef   : > { %v1322_v55 = vmul.f32 %v2467_v7, %v2390_v50  ;;  %v1336_v62 = vadd.f32 %v1321_v60, %v1320_v54  ;;  %v1361_v0 = vmul.f32 %v1321_v60, %v2465_v5 }
 0x3f0   : > { %v2469_v8 = vpop.f32.mrf.mxu1 }
 0x3f1   : > { %v1323_v51 = vmul.f32 %v2469_v8, %v2392_v52 }
 0x3f2   : > { %v2471_v9 = vpop.f32.mrf.mxu1 }
 0x3f3   : > { %v1324_v47 = vmul.f32 %v2471_v9, %v2390_v50  ;;  %v1339_v57 = vadd.f32 %v1323_v51, %v1322_v55 }
 0x3f4   : > { %v2473_v10 = vpop.f32.mrf.mxu1 }
 0x3f5   : > { %v1325_v45 = vmul.f32 %v2473_v10, %v2392_v52  ;;  %v1364_v63 = vmul.f32 %v1324_v47, %v2471_v9 }
 0x3f6   : > { %v2475_v11 = vpop.f32.mrf.mxu1 }
 0x3f7   : > { %v1326_v12 = vmul.f32 %v2475_v11, %v2390_v50  ;;  %v1342_v48 = vadd.f32 %v1325_v45, %v1324_v47  ;;  %v1365_v59 = vmul.f32 %v1325_v45, %v2473_v10 }
 0x3f8   : > { %v2477_v2 = vpop.f32.mrf.mxu1 }
 0x3f9   : > { %v1327_v13 = vmul.f32 %v2477_v2, %v2392_v52  ;;  %v1366_v58 = vmul.f32 %v1326_v12, %v2475_v11  ;;  %v1382_v1 = vadd.f32 %v1365_v59, %v1364_v63 }
 0x3fa   : > { %v2483_v14 = vpop.f32.mrf.mxu1 }
 0x3fb   : > { %v1345_v15 = vadd.f32 %v1327_v13, %v1326_v12  ;;  %v1328_v16 = vmul.f32 %v2483_v14, %v2390_v50  ;;  %v1367_v56 = vmul.f32 %v1327_v13, %v2477_v2  ;;  %v1363_v12 = vmul.f32 %v1323_v51, %v2469_v8 }
 0x3fc   : > { %v2487_v17 = vpop.f32.mrf.mxu1  ;;  %v1376_v13 = vadd.f32 %v1361_v0, %v1360_v3 }
 0x3fd   : > { %1346 = vadd.xlane.f32.xlu1 %v1345_v15  ;;  %v1329_v18 = vmul.f32 %v2487_v17, %v2392_v52  ;;  %v1368_v21 = vmul.f32 %v1328_v16, %v2483_v14  ;;  %v1385_v61 = vadd.f32 %v1367_v56, %v1366_v58  ;;  %v1362_v15 = vmul.f32 %v1322_v55, %v2467_v7 }
 0x3fe   : > { %v2491_v19 = vpop.f32.mrf.mxu1 }
 0x3ff   : > { %v1348_v20 = vadd.f32 %v1329_v18, %v1328_v16  ;;  %v1369_v22 = vmul.f32 %v1329_v18, %v2487_v17  ;;  %v1330_v23 = vmul.f32 %v2491_v19, %v2390_v50  ;;  %v1379_v16 = vadd.f32 %v1363_v12, %v1362_v15 }
 0x400   : > { %v2497_v24 = vpop.f32.mrf.mxu1  ;;  %v2225_v18 = vmov 2  }
 0x401   : > { %1349 = vadd.xlane.f32.xlu1 %v1348_v20  ;;  %v1388_v25 = vadd.f32 %v1369_v22, %v1368_v21  ;;  %v1331_v26 = vmul.f32 %v2497_v24, %v2392_v52  ;;  %v1370_v29 = vmul.f32 %v1330_v23, %v2491_v19  ;;  %2171 = vset.pattern.permute.xlu0 %v2225_v18 }
 0x402   : > { %v2501_v27 = vpop.f32.mrf.mxu1  ;;  %2172 = vset.pattern.permute.xlu1 %v2225_v18 }
 0x403   : > { %1389 = vadd.xlane.f32.xlu0 %v1388_v25  ;;  %v1351_v28 = vadd.f32 %v1331_v26, %v1330_v23  ;;  %v1371_v31 = vmul.f32 %v1331_v26, %v2497_v24  ;;  %v1332_v37 = vmul.f32 %v2501_v27, %v2390_v50 }
 0x404   : > { %v2505_v32 = vpop.f32.mrf.mxu1 }
 0x405   : > { %1352 = vadd.xlane.f32.xlu1 %v1351_v28  ;;  %v1391_v34 = vadd.f32 %v1371_v31, %v1370_v29  ;;  %v1333_v35 = vmul.f32 %v2505_v32, %v2392_v52  ;;  %v1372_v44 = vmul.f32 %v1332_v37, %v2501_v27 }
 0x406   : > { %v2509_v36 = vpop.f32.mrf.mxu1 }
 0x407   : > { %1392 = vadd.xlane.f32.xlu0 %v1391_v34  ;;  %v1354_v40 = vadd.f32 %v1333_v35, %v1332_v37  ;;  %v1334_v41 = vmul.f32 %v2509_v36, %v2390_v50  ;;  %v1373_v42 = vmul.f32 %v1333_v35, %v2505_v32 }
 0x408   : > { %v2513_v38 = vpop.f32.mrf.mxu1 }
 0x409   : > { %v1335_v39 = vmul.f32 %v2513_v38, %v2392_v52  ;;  %v1394_v6 = vadd.f32 %v1373_v42, %v1372_v44  ;;  %v1374_v49 = vmul.f32 %v1334_v41, %v2509_v36 }
 0x40b   : > { %1355 = vadd.xlane.f32.xlu0 %v1354_v40  ;;  %v1357_v43 = vadd.f32 %v1335_v39, %v1334_v41  ;;  %v1375_v46 = vmul.f32 %v1335_v39, %v2513_v38 }
 0x40d   : > { %1358 = vadd.xlane.f32.xlu1 %v1357_v43  ;;  %v1397_v53 = vadd.f32 %v1375_v46, %v1374_v49  ;;  %v2556_v49 = vld [vmem:[%s2727_s2 + $0x98] sm:$0xff] }
 0x40f   : > { %1395 = vadd.xlane.f32.xlu0 %v1394_v6 }
 0x411   : > { %1343 = vadd.xlane.f32.xlu1 %v1342_v48 }
 0x413   : > { %1398 = vadd.xlane.f32.xlu0 %v1397_v53 }
 0x415   : > { %1340 = vadd.xlane.f32.xlu1 %v1339_v57 }
 0x417   : > { %1386 = vadd.xlane.f32.xlu0 %v1385_v61 }
 0x419   : > { %1337 = vadd.xlane.f32.xlu1 %v1336_v62 }
 0x41b   : > { %1383 = vadd.xlane.f32.xlu0 %v1382_v1 }
 0x41d   : > { %1377 = vadd.xlane.f32.xlu1 %v1376_v13 }
 0x41f   : > { %1380 = vadd.xlane.f32.xlu0 %v1379_v16 }
 0x486   : > { %v2545_v20 = vpop.xlane.xlu1 %1346 }
 0x487   : > { %v1403_v51 = vmul.f32 %v2545_v20, %v2545_v20 }
 0x48a   : > { %v1350_v21 = vpop.xlane.xlu1 %1349 }
 0x48b   : > { %v1404_v22 = vmul.f32 %v1350_v21, %v1350_v21 }
 0x48c   : > { %v1390_v23 = vpop.xlane.xlu0 %1389 }
 0x48d   : > { %v1412_v25 = vsub.f32 %v1390_v23, %v1404_v22 }
 0x48e   : > { %v2547_v26 = vpop.xlane.xlu1 %1352 }
 0x48f   : > { %v1420_v28 = vmax.f32 %v1412_v25, 0.0  ;;  %v1405_v29 = vmul.f32 %v2547_v26, %v2547_v26 }
 0x490   : > { %v1393_v31 = vpop.xlane.xlu0 %1392 }
 0x491   : > { %v1428_v34 = vadd.f32 1e-05, %v1420_v28  ;;  %v1413_v35 = vsub.f32 %v1393_v31, %v1405_v29 }
 0x493   : > { %2181 = vrsqrt.f32 %v1428_v34  ;;  %v1421_v39 = vmax.f32 %v1413_v35, 0.0 }
 0x494   : > { %v1356_v37 = vpop.xlane.xlu0 %1355 }
 0x495   : > { %v1406_v41 = vmul.f32 %v1356_v37, %v1356_v37  ;;  %v1429_v44 = vadd.f32 1e-05, %v1421_v39  ;;  %v2575_v39 = vld [vmem:[%s2727_s2 + $0xb8] sm:$0xff] }
 0x496   : > { %v2551_v40 = vpop.xlane.xlu1 %1358 }
 0x497   : > { %2183 = vrsqrt.f32 %v1429_v44  ;;  %v1407_v16 = vmul.f32 %v2551_v40, %v2551_v40 }
 0x498   : > { %v1396_v42 = vpop.xlane.xlu0 %1395 }
 0x499   : > { %v1414_v43 = vsub.f32 %v1396_v42, %v1406_v41 }
 0x49a   : > { %v1344_v45 = vpop.xlane.xlu1 %1343 }
 0x49b   : > { %v1422_v46 = vmax.f32 %v1414_v43, 0.0  ;;  %v1402_v60 = vmul.f32 %v1344_v45, %v1344_v45 }
 0x49c   : > { %v1399_v6 = vpop.xlane.xlu0 %1398 }
 0x49d   : > { %v1430_v47 = vadd.f32 1e-05, %v1422_v46  ;;  %v1415_v29 = vsub.f32 %v1399_v6, %v1407_v16  ;;  %v2583_v6 = vld [vmem:[%s2727_s2 + $0x78] sm:$0xff] }
 0x49e   : > { %v1341_v48 = vpop.xlane.xlu1 %1340 }
 0x49f   : > { %2185 = vrsqrt.f32 %v1430_v47  ;;  %v1401_v3 = vmul.f32 %v1341_v48, %v1341_v48  ;;  %v1423_v43 = vmax.f32 %v1415_v29, 0.0 }
 0x4a0   : > { %v2182_v53 = vpop.eup %2181  ;;  %v1387_v55 = vpop.xlane.xlu0 %1386 }
 0x4a1   : > { %v1411_v56 = vsub.f32 %v1387_v55, %v1403_v51  ;;  %v2561_v57 = vmul.f32 %v2182_v53, %v2556_v49  ;;  %v1431_v47 = vadd.f32 1e-05, %v1423_v43 }
 0x4a2   : > { %v1338_v58 = vpop.xlane.xlu1 %1337 }
 0x4a3   : > { %v1419_v61 = vmax.f32 %v1411_v56, 0.0  ;;  %v1508_v54 = vmul.f32 %v2561_v57, %v1350_v21  ;;  %v1400_v63 = vmul.f32 %v1338_v58, %v1338_v58  ;;  %v2570_v21 = vld [vmem:[%s2727_s2 + $0xd8] sm:$0xff] }
 0x4a4   : > { %v1384_v59 = vpop.xlane.xlu0 %1383  ;;  %v2184_v28 = vpop.eup %2183 }
 0x4a5   : > { %v1427_v62 = vadd.f32 1e-05, %v1419_v61  ;;  %v1410_v0 = vsub.f32 %v1384_v59, %v1402_v60  ;;  %1528 = vrot.lane.b32.xlu0 %v1508_v54, %s2224_s18  ;;  %v1445_v46 = vmul.f32 %v2184_v28, %v2575_v39 }
 0x4a6   : > { %v1378_v1 = vpop.xlane.xlu1 %1377 }
 0x4a7   : > { %2187 = vrsqrt.f32 %v1427_v62  ;;  %v1418_v12 = vmax.f32 %v1410_v0, 0.0  ;;  %v1408_v13 = vsub.f32 %v1378_v1, %v1400_v63  ;;  %v1509_v51 = vmul.f32 %v1445_v46, %v2547_v26 }
 0x4a8   : > { %v1381_v15 = vpop.xlane.xlu0 %1380 }
 0x4a9   : > { %v1426_v22 = vadd.f32 1e-05, %v1418_v12  ;;  %v1416_v23 = vmax.f32 %v1408_v13, 0.0  ;;  %v1409_v25 = vsub.f32 %v1381_v15, %v1401_v3  ;;  %v2604_v3 = vld [vmem:[%s2727_s2 + $0xf8] sm:$0xff] }
 0x4ab   : > { %2189 = vrsqrt.f32 %v1426_v22  ;;  %v1424_v31 = vadd.f32 1e-05, %v1416_v23  ;;  %v1417_v34 = vmax.f32 %v1409_v25, 0.0 }
 0x4ac   : > { %v2186_v35 = vpop.eup %2185 }
 0x4ad   : > { %2191 = vrsqrt.f32 %v1424_v31  ;;  %v1425_v41 = vadd.f32 1e-05, %v1417_v34  ;;  %v1446_v42 = vmul.f32 %v2186_v35, %v2570_v21 }
 0x4af   : > { %2193 = vrsqrt.f32 %v1425_v41  ;;  %v1510_v44 = vmul.f32 %v1446_v42, %v1356_v37  ;;  %v2591_v37 = vld [vmem:[%s2727_s2 + $0x58] sm:$0xff] }
 0x4b0   : > { %2195 = vrsqrt.f32 %v1431_v47 }
 0x4b1   : > { %1532 = vrot.lane.b32.xlu1 %v1510_v44, %s2224_s18 }
 0x4b4   : > { %v2188_v53 = vpop.eup %2187 }
 0x4b5   : > { %1530 = vrot.lane.b32.xlu1 %v1509_v51, %s2224_s18  ;;  %v1443_v55 = vmul.f32 %v2188_v53, %v2583_v6 }
 0x4b7   : > { %v1507_v56 = vmul.f32 %v1443_v55, %v2545_v20 }
 0x4b8   : > { %v2190_v60 = vpop.eup %2189 }
 0x4b9   : > { %1526 = vrot.lane.b32.xlu1 %v1507_v56, %s2224_s18  ;;  %v1442_v61 = vmul.f32 %v2190_v60, %v2591_v37 }
 0x4ba   : > { %v2192_v54 = vpop.eup %2191 }
 0x4bb   : > { %v1506_v26 = vmul.f32 %v1442_v61, %v1344_v45  ;;  %v1440_v59 = vmul.f32 %v2192_v54, %v2415_v33 }
 0x4bc   : > { %v2194_v62 = vpop.eup %2193 }
 0x4bd   : > { %1524 = vrot.lane.b32.xlu0 %v1506_v26, %s2224_s18  ;;  %v1441_v63 = vmul.f32 %v2194_v62, %v2409_v30  ;;  %v1504_v1 = vmul.f32 %v1440_v59, %v1338_v58  ;;  %v2196_v20 = vpop.eup %2195  ;;  %v2226_v58 = vmov 3  }
 0x4be   : > { %v1447_v45 = vmul.f32 %v2196_v20, %v2604_v3 }
 0x4bf   : > { %v1505_v0 = vmul.f32 %v1441_v63, %v1341_v48 }
 0x4c0   : > { %v1511_v48 = vmul.f32 %v1447_v45, %v2551_v40 }
 0x4c1   : > { %1522 = vrot.lane.b32.xlu1 %v1505_v0, %s2224_s18  ;;  %1520 = vrot.lane.b32.xlu0 %v1504_v1, %s2224_s18 }
 0x4c5   : > { %1475 = vperm.xlu1 %2172, %v1445_v46   ;;  %1480 = vperm.xlu0 %2171, %v1446_v42  }
 0x4c9   : > { %1470 = vperm.xlu1 %2172, %v2561_v57   ;;  %1465 = vperm.xlu0 %2171, %v1443_v55  }
 0x4cd   : > { %1460 = vperm.xlu1 %2172, %v1442_v61   ;;  %1534 = vrot.lane.b32.xlu0 %v1511_v48, %s2224_s18  ;;  %s2227_s18 = smov 124  }
 0x4ce   : > { %2173 = vset.pattern.permute.xlu0 %v2226_v58 }
 0x4d1   : > { %1455 = vperm.xlu1 %2172, %v1441_v63  }
 0x4d5   : > { %1485 = vperm.xlu1 %2172, %v1447_v45  }
 0x4d9   : > { %2174 = vset.pattern.permute.xlu1 %v2226_v58 }
 0x517   : > { %v1529_v12 = vpop.permute.xlu0 %1528 }
 0x518   : > { %v1548_v13 = vsub.f32 %v2556_v49, %v1529_v12 }
 0x51a   : > { %1574 = vperm.xlu1 %2174, %v1548_v13  }
 0x523   : > { %v1533_v15 = vpop.permute.xlu1 %1532 }
 0x524   : > { %v1550_v23 = vsub.f32 %v2570_v21, %v1533_v15 }
 0x527   : > { %v1531_v16 = vpop.permute.xlu1 %1530 }
 0x528   : > { %v1549_v22 = vsub.f32 %v2575_v39, %v1531_v16 }
 0x52a   : > { %1579 = vperm.xlu1 %2174, %v1549_v22  }
 0x52b   : > { %v1527_v57 = vpop.permute.xlu1 %1526 }
 0x52c   : > { %v1547_v40 = vsub.f32 %v2583_v6, %v1527_v57 }
 0x52e   : > { %1569 = vperm.xlu0 %2173, %v1547_v40  }
 0x52f   : > { %v1525_v25 = vpop.permute.xlu0 %1524 }
 0x530   : > { %v1546_v41 = vsub.f32 %v2591_v37, %v1525_v25 }
 0x532   : > { %1584 = vperm.xlu0 %2173, %v1550_v23  }
 0x533   : > { %v1521_v28 = vpop.permute.xlu0 %1520  ;;  %v1523_v42 = vpop.permute.xlu1 %1522 }
 0x534   : > { %v1545_v43 = vsub.f32 %v2409_v30, %v1523_v42  ;;  %v1544_v44 = vsub.f32 %v2415_v33, %v1521_v28 }
 0x536   : > { %2175 = vset.pattern.permute.xlu0 %v2225_v18 }
 0x537   : > { %1450 = vperm.xlu0 %2175, %v1440_v59  }
 0x53b   : > { %2176 = vset.pattern.permute.xlu0 %v2226_v58 }
 0x540   : > { %v1481_v29 = vpop.permute.xlu0 %1480  ;;  %v1476_v18 = vpop.permute.xlu1 %1475 }
 0x541   : > { %v1500_v60 = vmul.f32 %v1481_v29, %v2501_v27  ;;  %v1501_v61 = vmul.f32 %v1481_v29, %v2505_v32  ;;  %v1498_v29 = vmul.f32 %v1476_v18, %v2491_v19 }
 0x544   : > { %v1466_v31 = vpop.permute.xlu0 %1465  ;;  %v1471_v51 = vpop.permute.xlu1 %1470 }
 0x545   : > { %v1494_v46 = vmul.f32 %v1466_v31, %v2475_v11  ;;  %v1495_v47 = vmul.f32 %v1466_v31, %v2477_v2  ;;  %v1496_v16 = vmul.f32 %v1471_v51, %v2483_v14  ;;  %v1497_v22 = vmul.f32 %v1471_v51, %v2487_v17 }
 0x548   : > { %v1535_v34 = vpop.permute.xlu0 %1534  ;;  %v1461_v62 = vpop.permute.xlu1 %1460 }
 0x549   : > { %v1551_v35 = vsub.f32 %v2604_v3, %v1535_v34  ;;  %v1492_v25 = vmul.f32 %v1461_v62, %v2471_v9  ;;  %v1493_v28 = vmul.f32 %v1461_v62, %v2473_v10  ;;  %v1499_v34 = vmul.f32 %v1476_v18, %v2497_v24 }
 0x54b   : > { %1589 = vperm.xlu1 %2174, %v1551_v35  }
 0x54c   : > { %v1456_v58 = vpop.permute.xlu1 %1455 }
 0x54d   : > { %v1490_v51 = vmul.f32 %v1456_v58, %v2467_v7  ;;  %v1491_v9 = vmul.f32 %v1456_v58, %v2469_v8 }
 0x54f   : > { %1564 = vperm.xlu1 %2174, %v1546_v41  }
 0x550   : > { %v2627_v12 = vpop.permute.xlu1 %1485 }
 0x553   : > { %1559 = vperm.xlu1 %2174, %v1545_v43  }
 0x557   : > { %1554 = vperm.xlu1 %2174, %v1544_v44  }
 0x595   : > { %v1575_v13 = vpop.permute.xlu1 %1574 }
 0x596   : > { %v1600_v40 = vadd.f32 %v1575_v13, %v1496_v16  ;;  %v1601_v23 = vadd.f32 %v1575_v13, %v1497_v22  ;;  %v2197_v16 = vld [vmem:[%s2275_s22] sm:$0x1f] }
 0x597   : > { %v1696_v22 = vrot.slane %v2197_v16, 3 }
 0x598   : > { %v1616_v17 = vmax.f32 %v1600_v40, 0.0  ;;  %v1617_v41 = vmax.f32 %v1601_v23, 0.0 }
 0x599   : > { %2094 = vmatprep.subr.msk.mxu0 %vm1714_vm11, %v1696_v22 }
 0x59a   : > { %v1632_v24 = vmul.f32 %v1616_v17, %v2390_v50  ;;  %v1633_v18 = vmul.f32 %v1617_v41, %v2392_v52  ;;  %2095 = vmatpush3.msk.msra.mxu0 %vm1714_vm11, %v1696_v22 }
 0x5a5   : > { %v1580_v15 = vpop.permute.xlu1 %1579 }
 0x5a6   : > { %v1602_v42 = vadd.f32 %v1580_v15, %v1498_v29  ;;  %v1603_v43 = vadd.f32 %v1580_v15, %v1499_v34 }
 0x5a9   : > { %v1570_v53 = vpop.permute.xlu0 %1569 }
 0x5aa   : > { %v1598_v55 = vadd.f32 %v1570_v53, %v1494_v46  ;;  %v1599_v56 = vadd.f32 %v1570_v53, %v1495_v47  ;;  %v1618_v53 = vmax.f32 %v1602_v42, 0.0  ;;  %v1665_v42 = vld [vmem:[%s2727_s2 + $0x30] sm:$0xff] }
 0x5ac   : > { %v1614_v54 = vmax.f32 %v1598_v55, 0.0  ;;  %v1615_v26 = vmax.f32 %v1599_v56, 0.0  ;;  %v1619_v55 = vmax.f32 %v1603_v43, 0.0  ;;  %v1634_v7 = vmul.f32 %v1618_v53, %v2390_v50  ;;  %v1666_v43 = vld [vmem:[%s2727_s2 + $0x50] sm:$0xff] }
 0x5ad   : > { %v1585_v59 = vpop.permute.xlu0 %1584 }
 0x5ae   : > { %v1604_v63 = vadd.f32 %v1585_v59, %v1500_v60  ;;  %v1605_v0 = vadd.f32 %v1585_v59, %v1501_v61  ;;  %v1630_v1 = vmul.f32 %v1614_v54, %v2390_v50  ;;  %v1631_v11 = vmul.f32 %v1615_v26, %v2392_v52 }
 0x5af   : > { %v1652_v54 = vadd.f32 %v1633_v18, %v1632_v24  ;;  %v1635_v8 = vmul.f32 %v1619_v55, %v2392_v52 }
 0x5b0   : > { %v1620_v20 = vmax.f32 %v1604_v63, 0.0  ;;  %v1621_v2 = vmax.f32 %v1605_v0, 0.0  ;;  %v1649_v45 = vadd.f32 %v1631_v11, %v1630_v1 }
 0x5b1   : > { %v1655_v63 = vadd.f32 %v1635_v8, %v1634_v7 }
 0x5b2   : > { %1650 = vadd.xlane.f32.xlu1 %v1649_v45  ;;  %v1636_v48 = vmul.f32 %v1620_v20, %v2390_v50  ;;  %v1637_v27 = vmul.f32 %v1621_v2, %v2392_v52  ;;  %v1451_v62 = vpop.permute.xlu0 %1450 }
 0x5b3   : > { %v1488_v20 = vmul.f32 %v1451_v62, %v2463_v4  ;;  %v1489_v2 = vmul.f32 %v1451_v62, %v2465_v5  ;;  %v1502_v4 = vmul.f32 %v2627_v12, %v2509_v36 }
 0x5b4   : > { %v1658_v32 = vadd.f32 %v1637_v27, %v1636_v48 }
 0x5b6   : > { %1659 = vadd.xlane.f32.xlu1 %v1658_v32 }
 0x5c6   : > { %v2631_v57 = vpop.permute.xlu1 %1589 }
 0x5c7   : > { %1680 = vrot.lane.b32.xlu1 %v2415_v33, %s2227_s18  ;;  %v1606_v5 = vadd.f32 %v2631_v57, %v1502_v4 }
 0x5ca   : > { %v1565_v31 = vpop.permute.xlu1 %1564 }
 0x5cb   : > { %v1596_v14 = vadd.f32 %v1565_v31, %v1492_v25  ;;  %v1597_v35 = vadd.f32 %v1565_v31, %v1493_v28 }
 0x5cd   : > { %v1612_v44 = vmax.f32 %v1596_v14, 0.0  ;;  %v1613_v46 = vmax.f32 %v1597_v35, 0.0  ;;  %v1664_v35 = vld [vmem:[%s2727_s2 + $0x10] sm:$0xff] }
 0x5ce   : > { %v1560_v47 = vpop.permute.xlu1 %1559 }
 0x5cf   : > { %v1628_v10 = vmul.f32 %v1612_v44, %v2390_v50  ;;  %v1629_v19 = vmul.f32 %v1613_v46, %v2392_v52  ;;  %v1594_v56 = vadd.f32 %v1560_v47, %v1490_v51  ;;  %v1595_v60 = vadd.f32 %v1560_v47, %v1491_v9  ;;  %v1667_v44 = vld [vmem:[%s2727_s2 + $0x70] sm:$0xff] }
 0x5d0   : > { %v1668_v46 = vld [vmem:[%s2727_s2 + $0x90] sm:$0xff] }
 0x5d1   : > { %v1646_v61 = vadd.f32 %v1629_v19, %v1628_v10  ;;  %v1610_v26 = vmax.f32 %v1594_v56, 0.0  ;;  %v1611_v59 = vmax.f32 %v1595_v60, 0.0  ;;  %v1669_v47 = vld [vmem:[%s2727_s2 + $0xb0] sm:$0xff] }
 0x5d2   : > { %v1555_v11 = vpop.permute.xlu1 %1554  ;;  %v1670_v51 = vld [vmem:[%s2727_s2 + $0xd0] sm:$0xff] }
 0x5d3   : > { %1647 = vadd.xlane.f32.xlu0 %v1646_v61  ;;  %v1626_v0 = vmul.f32 %v1610_v26, %v2390_v50  ;;  %v1627_v1 = vmul.f32 %v1611_v59, %v2392_v52  ;;  %v1592_v45 = vadd.f32 %v1555_v11, %v1488_v20  ;;  %v1593_v48 = vadd.f32 %v1555_v11, %v1489_v2  ;;  %v1671_v9 = vld [vmem:[%s2727_s2 + $0xf0] sm:$0xff] }
 0x5d5   : > { %v1643_v27 = vadd.f32 %v1627_v1, %v1626_v0  ;;  %v1608_v58 = vmax.f32 %v1592_v45, 0.0  ;;  %v1609_v32 = vmax.f32 %v1593_v48, 0.0 }
 0x5d7   : > { %1653 = vadd.xlane.f32.xlu0 %v1652_v54  ;;  %v1624_v13 = vmul.f32 %v1608_v58, %v2390_v50  ;;  %v1625_v15 = vmul.f32 %v1609_v32, %v2392_v52 }
 0x5d9   : > { %v1640_v40 = vadd.f32 %v1625_v15, %v1624_v13 }
 0x5db   : > { %1656 = vadd.xlane.f32.xlu0 %v1655_v63 }
 0x5df   : > { %1644 = vadd.xlane.f32.xlu0 %v1643_v27 }
 0x5eb   : > { %1641 = vadd.xlane.f32.xlu1 %v1640_v40 }
 0x5f5   : > { %1682 = vrot.lane.b32.xlu0 %v2409_v30, %s2227_s18  ;;  %v1503_v30 = vmul.f32 %v2627_v12, %v2513_v38 }
 0x5f9   : > { %1684 = vrot.lane.b32.xlu0 %v2591_v37, %s2227_s18  ;;  %v1607_v37 = vadd.f32 %v2631_v57, %v1503_v30 }
 0x5fb   : > { %v1623_v23 = vmax.f32 %v1607_v37, 0.0 }
 0x5fd   : > { %1686 = vrot.lane.b32.xlu0 %v2583_v6, %s2227_s18  ;;  %v1622_v6 = vmax.f32 %v1606_v5, 0.0  ;;  %v1639_v25 = vmul.f32 %v1623_v23, %v2392_v52 }
 0x601   : > { %1688 = vrot.lane.b32.xlu0 %v2556_v49, %s2227_s18  ;;  %v1638_v49 = vmul.f32 %v1622_v6, %v2390_v50 }
 0x605   : > { %1690 = vrot.lane.b32.xlu0 %v2575_v39, %s2227_s18  ;;  %v1661_v39 = vadd.f32 %v1639_v25, %v1638_v49 }
 0x609   : > { %1692 = vrot.lane.b32.xlu0 %v2570_v21, %s2227_s18 }
 0x628   : > { %1662 = vadd.xlane.f32.xlu0 %v1661_v39 }
 0x63b   : > { %v1651_v28 = vpop.xlane.xlu1 %1650 }
 0x63e   : > { %1694 = vrot.lane.b32.xlu0 %v2604_v3, %s2227_s18 }
 0x63f   : > { %v1660_v36 = vpop.xlane.xlu1 %1659 }
 0x642   : > { %1938 = vrot.lane.b32.xlu0 %v2415_v33, %s2211_s26 }
 0x643   : > { %v1681_v38 = vpop.permute.xlu1 %1680 }
 0x644   : > { %2096 = vmatprep.mubr.msk.f32.mxu0 %vm1697_vm12, %v1681_v38 }
 0x65c   : > { %v1648_v21 = vpop.xlane.xlu0 %1647 }
 0x660   : > { %v1654_v12 = vpop.xlane.xlu0 %1653 }
 0x664   : > { %v1657_v57 = vpop.xlane.xlu0 %1656 }
 0x668   : > { %v1645_v50 = vpop.xlane.xlu0 %1644 }
 0x66c   : > { %v1683_v29 = vpop.permute.xlu0 %1682 }
 0x66d   : > { %2097 = vmatmul.mubr.msk.f32.vlgmr.msra.gmra.mxu0 %vm1697_vm12, %v1683_v29 }
 0x670   : > { %v1685_v52 = vpop.permute.xlu0 %1684 }
 0x671   : > { %2099 = vmatprep.mubr.msk.f32.mxu0 %vm1697_vm12, %v1685_v52 }
 0x674   : > { %v1687_v31 = vpop.permute.xlu0 %1686  ;;  %v1642_v41 = vpop.xlane.xlu1 %1641 }
 0x675   : > { %2100 = vmatmul.mubr.msk.f32.gmra.mxu0 %vm1697_vm12, %v1687_v31 }
 0x678   : > { %v1689_v3 = vpop.permute.xlu0 %1688 }
 0x679   : > { %2102 = vmatprep.mubr.msk.f32.mxu0 %vm1697_vm12, %v1689_v3 }
 0x67c   : > { %v1691_v33 = vpop.permute.xlu0 %1690 }
 0x67d   : > { %2103 = vmatmul.mubr.msk.f32.gmra.mxu0 %vm1697_vm12, %v1691_v33 }
 0x680   : > { %v1693_v34 = vpop.permute.xlu0 %1692 }
 0x681   : > { %2105 = vmatprep.mubr.msk.f32.mxu0 %vm1697_vm12, %v1693_v34 }
 0x6b1   : > { %v1663_v14 = vpop.xlane.xlu0 %1662 }
 0x6b2   : > { %2108 = vmatprep.subr.mxu0 %v1663_v14 }
 0x6b3   : > { %2109 = vmatpush3.msra.mxu0 %v1663_v14 }
 0x6b4   : > { %2110 = vmatprep.subr.mxu0 %v1660_v36 }
 0x6b5   : > { %2111 = vmatpush3.msra.mxu0 %v1660_v36  ;;  %v1695_v17 = vpop.permute.xlu0 %1694 }
 0x6b6   : > { %2112 = vmatprep.subr.mxu0 %v1657_v57  ;;  %2106 = vmatmul.mubr.msk.f32.gmra.mxu0 %vm1697_vm12, %v1695_v17 }
 0x6b7   : > { %2113 = vmatpush3.msra.mxu0 %v1657_v57  ;;  %2124 = vmatprep.mubr.msk.f32.mxu0 %vm1815_vm13, %v1664_v35 }
 0x6b8   : > { %2114 = vmatprep.subr.mxu0 %v1654_v12 }
 0x6b9   : > { %2115 = vmatpush3.msra.mxu0 %v1654_v12  ;;  %v1939_v26 = vpop.permute.xlu0 %1938 }
 0x6ba   : > { %2116 = vmatprep.subr.mxu0 %v1651_v28 }
 0x6bb   : > { %2117 = vmatpush3.msra.mxu0 %v1651_v28 }
 0x6bc   : > { %2118 = vmatprep.subr.mxu0 %v1648_v21 }
 0x6bd   : > { %2119 = vmatpush3.msra.mxu0 %v1648_v21 }
 0x6be   : > { %2120 = vmatprep.subr.mxu0 %v1645_v50 }
 0x6bf   : > { %2121 = vmatpush3.msra.mxu0 %v1645_v50 }
 0x6c0   : > { %2122 = vmatprep.subr.mxu0 %v1642_v41 }
 0x6c1   : > { %2123 = vmatpush3.msra.mxu0 %v1642_v41 }
 0x6c2   : > { %2125 = vmatmul.mubr.msk.f32.vlgmr.msra.gmra.mxu0 %vm1815_vm13, %v1665_v42 }
 0x6c3   : > { %2127 = vmatprep.mubr.msk.f32.mxu0 %vm1815_vm13, %v1666_v43 }
 0x6c6   : > { %2128 = vmatmul.mubr.msk.f32.gmra.mxu0 %vm1815_vm13, %v1667_v44 }
 0x6c7   : > { %2130 = vmatprep.mubr.msk.f32.mxu0 %vm1815_vm13, %v1668_v46 }
 0x6ca   : > { %2131 = vmatmul.mubr.msk.f32.gmra.mxu0 %vm1815_vm13, %v1669_v47 }
 0x6cb   : > { %2133 = vmatprep.mubr.msk.f32.mxu0 %vm1815_vm13, %v1670_v51 }
 0x6ce   : > { %2134 = vmatmul.mubr.msk.f32.gmra.mxu0 %vm1815_vm13, %v1671_v9 }
 0x72d   : > { %v2098_v10 = vpop.f32.mrf.mxu0 }
 0x72f   : > { %v1783_v19 = vpop.f32.mrf.mxu0 }
 0x735   : > { %v2101_v53 = vpop.f32.mrf.mxu0 }
 0x737   : > { %v1792_v24 = vpop.f32.mrf.mxu0 }
 0x73d   : > { %v2104_v18 = vpop.f32.mrf.mxu0 }
 0x73f   : > { %v1800_v55 = vpop.f32.mrf.mxu0 }
 0x776   : > { %v2107_v56 = vpop.f32.mrf.mxu0 }
 0x778   : > { %v1808_v60 = vpop.f32.mrf.mxu0 }
 0x782   : > { %v2126_v61 = vpop.f32.mrf.mxu0 }
 0x784   : > { %v1906_v54 = vpop.f32.mrf.mxu0 }
 0x785   : > { %v1907_v59 = vadd.f32 %v1906_v54, %v1783_v19 }
 0x786   : > { %v2129_v7 = vpop.f32.mrf.mxu0 }
 0x787   : > { %v1941_v8 = vadd.f32 %v1939_v26, %v1907_v59 }
 0x788   : > { %v1915_v62 = vpop.f32.mrf.mxu0 }
 0x789   : > { %1943 = vst.msk [vmem:[%s168_s20] sm:$0xf] %vm1942_vm14, %v1941_v8 }
 0x78a   : > { %v2132_v63 = vpop.f32.mrf.mxu0 }
 0x78c   : > { %v1923_v0 = vpop.f32.mrf.mxu0 }
 0x78e   : > { %v2135_v1 = vpop.f32.mrf.mxu0 }
 0x790   : > { %v1931_v11 = vpop.f32.mrf.mxu0 }
 0x791 PF: > { %s13_s12 = sadd.s32 1, %s2204_s12  }
 0x792   : > { %p10_p4 = scmp.ge.s32.totalorder %s13_s12, 6  }
 0x794   :  { %12 = sbr.rel (!%p10_p4) target bundleno = 1 (0x1), region = 62 }

</bundles_post_ra>
